<compile_context>
chip_gen: v5e
topology: v5e:2x2
jax: 0.10.0
libtpu: 0.0.40
codegen_flags: <defaults>
</compile_context>

<pallas_src>
import jax
import jax.numpy as jnp
from jax.experimental import pallas as pl
from jax.experimental.pallas import tpu as pltpu

# ---- model / problem sizes (small, toy-scale) ----
D = 32                    # embedding_dim
TWO_D = 2 * D
T = 8                     # history length
B = 16                    # batch

N_UID = N_MID = N_CID = 16
N_EMB = N_UID + N_MID + N_CID          # 48 rows in the packed embedding table

A_H0, A_H1 = 80, 40       # attention MLP hidden sizes (logical)
O_H0, O_H1 = 200, 80      # output MLP hidden sizes (logical)

# lane-padded widths used inside the kernel
H0P, H1P = 128, 128
OH0P, OH1P = 256, 128
OUTP = 128                # lane-dense score output; column 0 is the real score

# ---- index-array column layout (single int32 operand) ----
C_USER, C_MAT, C_CAT = 0, 1, 2
C_MHIST = 3
C_CHIST = 3 + T
C_SEQ = 3 + 2 * T
NCOLS = 4 + 2 * T         # 20

# ---- packed 128-lane weight slab row offsets ----
R_WFACT = 0               # (2D, 128)  == W_f - W_d
R_WITEM = 64              # (2D, 128)  == W_q + W_d
R_WFQ = 128               # (2D, 128)  == W_fq
R_AW1 = 192               # (128, 128)
R_OW1 = 320               # (256, 128)
R_OW2 = 576               # (128, 128)
R_AB0 = 704
R_AB1 = 705
R_AW2R = 706
R_OB1 = 707
R_OB2 = 708
WSLAB_ROWS = 712

# ---- packed 256-lane output-layer-0 slab row offsets ----
R_U = 0                   # user block (64 rows, first D live)
R_I = 64                  # item block (2D rows)
R_HS = 128                # hist_sum block
R_AT = 192                # attention block
R_OB0 = 256               # ob0 row
OW0_ROWS = 264


def _sigmoid(x):
    # logistic via tanh: one EUP transcendental per element (no exp + reciprocal).
    return 0.5 * (jnp.tanh(0.5 * x) + 1.0)


def make_din_kernel(bb):
    def din_kernel(idx_ref, emb_ref, w_ref, ow0_ref, out_ref):
        idx = idx_ref[...]                      # (bb, 20) int32
        emb = emb_ref[...]                      # (48, 64) f32

        user_i = idx[:, C_USER:C_USER + 1]      # (bb, 1)
        mat_i = idx[:, C_MAT:C_MAT + 1]
        cat_i = idx[:, C_CAT:C_CAT + 1]
        mat_h = idx[:, C_MHIST:C_MHIST + T]     # (bb, T)
        cat_h = idx[:, C_CHIST:C_CHIST + T]     # (bb, T)
        seq_i = idx[:, C_SEQ:C_SEQ + 1]         # (bb, 1)

        # ---- in-kernel embedding gather via one-/two-hot matmuls (idle MXU) ----
        lanes = jax.lax.broadcasted_iota(jnp.int32, (bb, N_EMB), 1)          # (bb, 48)
        user_oh = (lanes == user_i).astype(jnp.float32)
        item_oh = jnp.logical_or(lanes == mat_i + N_UID,
                                 lanes == cat_i + N_UID + N_MID).astype(jnp.float32)
        lanes_h = jax.lax.broadcasted_iota(jnp.int32, (T, N_EMB), 1)[None, :, :]  # (1, T, 48)
        hist_oh = jnp.logical_or(
            lanes_h == (mat_h + N_UID)[:, :, None],
            lanes_h == (cat_h + N_UID + N_MID)[:, :, None]).astype(jnp.float32)   # (bb, T, 48)

        user = jnp.dot(user_oh, emb, preferred_element_type=jnp.float32)     # (bb, 2D), first D live
        item = jnp.dot(item_oh, emb, preferred_element_type=jnp.float32)     # (bb, 2D)
        hist2 = jnp.dot(hist_oh.reshape(bb * T, N_EMB), emb,
                        preferred_element_type=jnp.float32)                  # (bb*T, 2D)
        hist = hist2.reshape(bb, T, TWO_D)

        # ---- mask / sequence length derived in-kernel (no extra DMA operands) ----
        valid = jax.lax.broadcasted_iota(jnp.int32, (bb, T), 1) < seq_i      # (bb, T) bool
        mask = valid.astype(jnp.float32)
        seqlen = seq_i.astype(jnp.float32)                                   # (bb, 1)

        # ---- packed weight slab slices (static, zero-cost) ----
        w_fact = w_ref[R_WFACT:R_WFACT + TWO_D, :]
        w_item = w_ref[R_WITEM:R_WITEM + TWO_D, :]
        w_fq = w_ref[R_WFQ:R_WFQ + TWO_D, :]
        aw1 = w_ref[R_AW1:R_AW1 + H0P, :]
        ow1 = w_ref[R_OW1:R_OW1 + OH0P, :]
        ow2 = w_ref[R_OW2:R_OW2 + OH1P, :]
        ab0 = w_ref[R_AB0:R_AB0 + 1, :]
        ab1 = w_ref[R_AB1:R_AB1 + 1, :]
        aw2r = w_ref[R_AW2R:R_AW2R + 1, :]
        ob1 = w_ref[R_OB1:R_OB1 + 1, :]
        ob2 = w_ref[R_OB2:R_OB2 + 1, :]

        # ---- attention MLP, batched over all bb*T (history, query) pairs ----
        prod2 = (hist * item[:, None, :]).reshape(bb * T, TWO_D)             # (bb*T, 2D)
        item_term = jnp.dot(item, w_item, preferred_element_type=jnp.float32) + ab0   # (bb, 128)
        z0 = (jnp.dot(hist2, w_fact, preferred_element_type=jnp.float32)
              + jnp.dot(prod2, w_fq, preferred_element_type=jnp.float32))    # (bb*T, 128)
        z0 = z0.reshape(bb, T, H0P) + item_term[:, None, :]
        h0 = _sigmoid(z0).reshape(bb * T, H0P)
        h1 = _sigmoid(jnp.dot(h0, aw1, preferred_element_type=jnp.float32) + ab1)     # (bb*T, 128)
        # ab2 dropped: a constant shift of all logits is a no-op under masked softmax.
        logits = jnp.sum(h1.reshape(bb, T, H1P) * aw2r, axis=-1)             # (bb, T)

        # ---- masked softmax over the history axis ----
        logits = jnp.where(valid, logits, jnp.float32(-2.0 ** 31))
        m = jnp.max(logits, axis=-1, keepdims=True)
        e = jnp.exp(logits - m)
        p = e * pl.reciprocal(jnp.sum(e, axis=-1, keepdims=True), approx=True) * mask

        # ---- weighted history sums (fully vectorized) ----
        hist_sum = jnp.sum(mask[:, :, None] * hist, axis=1) \
            * pl.reciprocal(seqlen, approx=True)                             # (bb, 2D)
        att = jnp.sum(p[:, :, None] * hist, axis=1)                          # (bb, 2D)

        # ---- output MLP; ow0 split by rows so there is no lane concat of `comb` ----
        z = (jnp.dot(user, ow0_ref[R_U:R_U + TWO_D, :], preferred_element_type=jnp.float32)
             + jnp.dot(item, ow0_ref[R_I:R_I + TWO_D, :], preferred_element_type=jnp.float32)
             + jnp.dot(hist_sum, ow0_ref[R_HS:R_HS + TWO_D, :], preferred_element_type=jnp.float32)
             + jnp.dot(att, ow0_ref[R_AT:R_AT + TWO_D, :], preferred_element_type=jnp.float32)
             + ow0_ref[R_OB0:R_OB0 + 1, :])
        o0 = jnp.maximum(z, 0.0)                                             # (bb, 256)
        o1 = jnp.maximum(jnp.dot(o0, ow1, preferred_element_type=jnp.float32) + ob1, 0.0)
        out_ref[...] = jnp.dot(o1, ow2, preferred_element_type=jnp.float32) + ob2

    return din_kernel


def _grid_steps(batch):
    """2 grid steps only where there are 2 TensorCores per chip (v7x); else 1."""
    kind = ""
    try:
        kind = jax.devices()[0].device_kind.lower()
    except Exception:
        pass
    if ("v7" in kind or "7x" in kind) and batch % 16 == 0:
        return 2
    return 1


def pack_embedding_table(user_table, mid_table, cid_table):
    emb = jnp.zeros((N_EMB, TWO_D), jnp.float32)
    emb = emb.at[0:N_UID, 0:D].set(user_table)
    emb = emb.at[N_UID:N_UID + N_MID, 0:D].set(mid_table)
    emb = emb.at[N_UID + N_MID:N_EMB, D:TWO_D].set(cid_table)
    return emb


def pack_indices(user, material, category, material_hist, category_hist, seq_len_i):
    return jnp.concatenate(
        [user[:, None], material[:, None], category[:, None],
         material_hist, category_hist, seq_len_i[:, None]], axis=1).astype(jnp.int32)


def pack_params(aw0, ab0, aw1, ab1, aw2_row, ow0, ob0, ow1, ob1, ow2, ob2):
    """Split / pad / pack the raw Linear parameters into two lane-dense slabs."""
    def padc(a, cols):
        return jnp.pad(a, ((0, 0), (0, cols - a.shape[1])))

    def padrc(a, rows, cols):
        return jnp.pad(a, ((0, rows - a.shape[0]), (0, cols - a.shape[1])))

    # aw0 rows: [fact | query | fact*query | query - fact], each 2D wide.
    w_f = aw0[0:TWO_D]
    w_q = aw0[TWO_D:2 * TWO_D]
    w_fq = aw0[2 * TWO_D:3 * TWO_D]
    w_d = aw0[3 * TWO_D:4 * TWO_D]

    wslab = jnp.zeros((WSLAB_ROWS, 128), jnp.float32)
    wslab = wslab.at[R_WFACT:R_WFACT + TWO_D, :].set(padc(w_f - w_d, H0P))
    wslab = wslab.at[R_WITEM:R_WITEM + TWO_D, :].set(padc(w_q + w_d, H0P))
    wslab = wslab.at[R_WFQ:R_WFQ + TWO_D, :].set(padc(w_fq, H0P))
    wslab = wslab.at[R_AW1:R_AW1 + H0P, :].set(padrc(aw1, H0P, H1P))
    wslab = wslab.at[R_OW1:R_OW1 + OH0P, :].set(padrc(ow1, OH0P, OH1P))
    wslab = wslab.at[R_OW2:R_OW2 + OH1P, :].set(padrc(ow2, OH1P, OUTP))
    wslab = wslab.at[R_AB0, :].set(padc(ab0, H0P)[0])
    wslab = wslab.at[R_AB1, :].set(padc(ab1, H1P)[0])
    wslab = wslab.at[R_AW2R, :].set(padc(aw2_row, H1P)[0])
    wslab = wslab.at[R_OB1, :].set(padc(ob1, OH1P)[0])
    wslab = wslab.at[R_OB2, :].set(padc(ob2, OUTP)[0])

    ow0slab = jnp.zeros((OW0_ROWS, OH0P), jnp.float32)
    ow0slab = ow0slab.at[R_U:R_U + D, :].set(padc(ow0[0:D], OH0P))            # user (lanes D..2D-1 of
    ow0slab = ow0slab.at[R_I:R_I + TWO_D, :].set(padc(ow0[D:3 * D], OH0P))    #   user_emb are zero)
    ow0slab = ow0slab.at[R_HS:R_HS + TWO_D, :].set(padc(ow0[3 * D:5 * D], OH0P))
    ow0slab = ow0slab.at[R_AT:R_AT + TWO_D, :].set(padc(ow0[5 * D:7 * D], OH0P))
    ow0slab = ow0slab.at[R_OB0, :].set(padc(ob0, OH0P)[0])
    return wslab, ow0slab


def din_forward(idx, emb_table, wslab, ow0slab):
    """Run the fully-fused DIN forward (gather + attention + MLPs). Returns (B,) scores."""
    batch = idx.shape[0]
    steps = _grid_steps(batch)
    bb = batch // steps
    kernel = make_din_kernel(bb)

    grid_spec = pltpu.PrefetchScalarGridSpec(
        num_scalar_prefetch=0,
        grid=(steps,),
        in_specs=[
            pl.BlockSpec((bb, NCOLS), lambda i: (i, 0)),        # packed int32 indices
            pl.BlockSpec(emb_table.shape, lambda i: (0, 0)),    # packed embedding table
            pl.BlockSpec(wslab.shape, lambda i: (0, 0)),        # 128-lane weight slab
            pl.BlockSpec(ow0slab.shape, lambda i: (0, 0)),      # 256-lane ow0/ob0 slab
        ],
        out_specs=pl.BlockSpec((bb, OUTP), lambda i: (i, 0)),
    )
    out = pl.pallas_call(
        kernel,
        out_shape=jax.ShapeDtypeStruct((batch, OUTP), jnp.float32),
        grid_spec=grid_spec,
        compiler_params=pltpu.CompilerParams(
            dimension_semantics=("parallel",)),
    )(idx, emb_table, wslab, ow0slab)
    return out[:, 0]


def din_reference(user, material, category, material_hist, category_hist, mask, seq_len,
                  user_table, mid_table, cid_table, params):
    """Pure-JAX (exact, un-split, un-fused) reference of the same forward pass."""
    aw0, ab0, aw1, ab1, aw2_row, ab2, ow0, ob0, ow1, ob1, ow2, ob2 = params
    user_emb = user_table[user]
    item_emb = jnp.concatenate([mid_table[material], cid_table[category]], axis=1)
    hist_emb = jnp.concatenate([mid_table[material_hist], cid_table[category_hist]], axis=2)

    hist_sum = jnp.einsum('bt,btd->bd', mask, hist_emb) / seq_len
    query = jnp.broadcast_to(item_emb[:, None, :], hist_emb.shape)
    feat = jnp.concatenate(
        [hist_emb, query, hist_emb * query, query - hist_emb], axis=2)
    h0 = 1.0 / (1.0 + jnp.exp(-(feat @ aw0 + ab0)))
    h1 = 1.0 / (1.0 + jnp.exp(-(h0 @ aw1 + ab1)))
    logits = jnp.sum(h1 * aw2_row[None], axis=-1) + ab2[0, 0]
    logits = jnp.where(mask > 0.5, logits, jnp.float32(-2.0 ** 31))
    m = jnp.max(logits, axis=-1, keepdims=True)
    e = jnp.exp(logits - m)
    p = (e / jnp.sum(e, axis=-1, keepdims=True)) * mask
    att = jnp.einsum('bt,btd->bd', p, hist_emb)
    comb = jnp.concatenate([user_emb, item_emb, hist_sum, att], axis=1)
    o0 = jnp.maximum(comb @ ow0 + ob0, 0.0)
    o1 = jnp.maximum(o0 @ ow1 + ob1, 0.0)
    return (o1 @ ow2 + ob2)[:, 0]


if __name__ == "__main__":
    key = jax.random.PRNGKey(0)
    ks = jax.random.split(key, 16)

    # ---- InputEmbedding tables (deterministic synthetic init) ----
    user_table = 0.1 * jax.random.normal(ks[0], (N_UID, D), jnp.float32)
    mid_table = 0.1 * jax.random.normal(ks[1], (N_MID, D), jnp.float32)
    cid_table = 0.1 * jax.random.normal(ks[2], (N_CID, D), jnp.float32)

    # ---- raw DIN inputs (the `data` tuple) ----
    user = jax.random.randint(ks[3], (B,), 0, N_UID)
    material = jax.random.randint(ks[4], (B,), 0, N_MID)
    category = jax.random.randint(ks[5], (B,), 0, N_CID)
    material_hist = jax.random.randint(ks[6], (B, T), 0, N_MID)
    category_hist = jax.random.randint(ks[7], (B, T), 0, N_CID)
    seq_len_i = jax.random.randint(ks[8], (B,), 1, T + 1)
    mask = (jnp.arange(T)[None, :] < seq_len_i[:, None]).astype(jnp.float32)
    seq_len = seq_len_i.astype(jnp.float32)[:, None]
    # material_historical_neg / category_historical_neg are unused (neg_sample=False).

    # ---- deterministic Linear parameters ----
    def linear_params(k, fan_in, fan_out):
        kw, kb = jax.random.split(k)
        bound = 1.0 / float(fan_in) ** 0.5
        w = jax.random.uniform(kw, (fan_in, fan_out), jnp.float32, -bound, bound)
        b = jax.random.uniform(kb, (1, fan_out), jnp.float32, -bound, bound)
        return w, b

    aw0, ab0 = linear_params(ks[9], 8 * D, A_H0)     # attention Linear(8D, 80)
    aw1, ab1 = linear_params(ks[10], A_H0, A_H1)     # attention Linear(80, 40)
    aw2_m, ab2 = linear_params(ks[11], A_H1, 1)      # attention Linear(40, 1)
    aw2_row = aw2_m.T                                # (1, 40) row vector
    ow0, ob0 = linear_params(ks[12], 7 * D, O_H0)    # output Linear(7D, 200)
    ow1, ob1 = linear_params(ks[13], O_H0, O_H1)     # output Linear(200, 80)
    ow2, ob2 = linear_params(ks[14], O_H1, 1)        # output Linear(80, 1)

    # ---- pack kernel operands (4 arrays total) ----
    idx = pack_indices(user, material, category, material_hist, category_hist, seq_len_i)
    emb_table = pack_embedding_table(user_table, mid_table, cid_table)
    wslab, ow0slab = pack_params(aw0, ab0, aw1, ab1, aw2_row, ow0, ob0, ow1, ob1, ow2, ob2)

    out = din_forward(idx, emb_table, wslab, ow0slab)
    out = jax.block_until_ready(out)

    ref_params = (aw0, ab0, aw1, ab1, aw2_row, ab2, ow0, ob0, ow1, ob1, ow2, ob2)
    ref = din_reference(user, material, category, material_hist, category_hist, mask, seq_len,
                        user_table, mid_table, cid_table, ref_params)

    assert out.shape == (B,), out.shape
    # Tolerance accounts for approx-reciprocal (EUP) in softmax / seq-len divides and
    # the tanh-form sigmoid vs the reference's 1/(1+exp(-x)).
    assert jnp.allclose(out, ref, rtol=5e-3, atol=5e-3), (out, ref)
    print("KERNEL_OK")
</pallas_src>

<mosaic_0001>
module attributes {stable_mosaic.version = 11 : i64} {
  func.func @din_kernel(%arg0: i32, %arg1: memref<16x20xi32, #tpu.memory_space<vmem>>, %arg2: memref<48x64xf32, #tpu.memory_space<vmem>>, %arg3: memref<712x128xf32, #tpu.memory_space<vmem>>, %arg4: memref<264x256xf32, #tpu.memory_space<vmem>>, %arg5: memref<16x128xf32, #tpu.memory_space<vmem>>) attributes {dimension_semantics = [#tpu.dimension_semantics<parallel>], iteration_bounds = array<i64: 1>, scalar_prefetch = 0 : i64, scratch_operands = 0 : i64, tpu.core_type = #tpu.core_type<tc>, window_params = [{transform_indices = @transform_0, window_bounds = array<i64: 16, 20>}, {pipeline_mode = #tpu.pipeline_mode<synchronous>, transform_indices = @transform_1, window_bounds = array<i64: 48, 64>}, {pipeline_mode = #tpu.pipeline_mode<synchronous>, transform_indices = @transform_2, window_bounds = array<i64: 712, 128>}, {pipeline_mode = #tpu.pipeline_mode<synchronous>, transform_indices = @transform_3, window_bounds = array<i64: 264, 256>}, {transform_indices = @transform_4, window_bounds = array<i64: 16, 128>}]} {
    %c0 = arith.constant 0 : index
    %c0_0 = arith.constant 0 : index
    %0 = vector.load %arg1[%c0, %c0_0] : memref<16x20xi32, #tpu.memory_space<vmem>>, vector<16x20xi32>
    %c0_1 = arith.constant 0 : index
    %c0_2 = arith.constant 0 : index
    %1 = vector.load %arg2[%c0_1, %c0_2] : memref<48x64xf32, #tpu.memory_space<vmem>>, vector<48x64xf32>
    %2 = vector.extract_strided_slice %0 {offsets = [0, 0], sizes = [16, 1], strides = [1, 1]} : vector<16x20xi32> to vector<16x1xi32>
    %3 = vector.extract_strided_slice %0 {offsets = [0, 1], sizes = [16, 1], strides = [1, 1]} : vector<16x20xi32> to vector<16x1xi32>
    %4 = vector.extract_strided_slice %0 {offsets = [0, 2], sizes = [16, 1], strides = [1, 1]} : vector<16x20xi32> to vector<16x1xi32>
    %5 = vector.extract_strided_slice %0 {offsets = [0, 3], sizes = [16, 8], strides = [1, 1]} : vector<16x20xi32> to vector<16x8xi32>
    %6 = vector.extract_strided_slice %0 {offsets = [0, 11], sizes = [16, 8], strides = [1, 1]} : vector<16x20xi32> to vector<16x8xi32>
    %7 = vector.extract_strided_slice %0 {offsets = [0, 19], sizes = [16, 1], strides = [1, 1]} : vector<16x20xi32> to vector<16x1xi32>
    %8 = tpu.iota {dimensions = array<i32: 1>} : vector<16x48xi32>
    %9 = vector.broadcast %2 : vector<16x1xi32> to vector<16x48xi32>
    %10 = arith.cmpi eq, %8, %9 : vector<16x48xi32>
    %11 = arith.extui %10 : vector<16x48xi1> to vector<16x48xi32>
    %12 = arith.sitofp %11 : vector<16x48xi32> to vector<16x48xf32>
    %c16_i32 = arith.constant 16 : i32
    %13 = vector.broadcast %c16_i32 : i32 to vector<16x1xi32>
    %14 = arith.addi %3, %13 : vector<16x1xi32>
    %15 = vector.broadcast %14 : vector<16x1xi32> to vector<16x48xi32>
    %16 = arith.cmpi eq, %8, %15 : vector<16x48xi32>
    %c16_i32_3 = arith.constant 16 : i32
    %17 = vector.broadcast %c16_i32_3 : i32 to vector<16x1xi32>
    %18 = arith.addi %4, %17 : vector<16x1xi32>
    %c16_i32_4 = arith.constant 16 : i32
    %19 = vector.broadcast %c16_i32_4 : i32 to vector<16x1xi32>
    %20 = arith.addi %18, %19 : vector<16x1xi32>
    %21 = vector.broadcast %20 : vector<16x1xi32> to vector<16x48xi32>
    %22 = arith.cmpi eq, %8, %21 : vector<16x48xi32>
    %23 = arith.ori %16, %22 : vector<16x48xi1>
    %24 = arith.extui %23 : vector<16x48xi1> to vector<16x48xi32>
    %25 = arith.sitofp %24 : vector<16x48xi32> to vector<16x48xf32>
    %26 = tpu.iota {dimensions = array<i32: 1>} : vector<8x48xi32>
    %27 = vector.shape_cast %26 : vector<8x48xi32> to vector<1x8x48xi32>
    %c16_i32_5 = arith.constant 16 : i32
    %28 = vector.broadcast %c16_i32_5 : i32 to vector<16x8xi32>
    %29 = arith.addi %5, %28 : vector<16x8xi32>
    %30 = vector.shape_cast %29 : vector<16x8xi32> to vector<16x8x1xi32>
    %31 = vector.broadcast %27 : vector<1x8x48xi32> to vector<16x8x48xi32>
    %32 = vector.broadcast %30 : vector<16x8x1xi32> to vector<16x8x48xi32>
    %33 = arith.cmpi eq, %31, %32 : vector<16x8x48xi32>
    %c16_i32_6 = arith.constant 16 : i32
    %34 = vector.broadcast %c16_i32_6 : i32 to vector<16x8xi32>
    %35 = arith.addi %6, %34 : vector<16x8xi32>
    %c16_i32_7 = arith.constant 16 : i32
    %36 = vector.broadcast %c16_i32_7 : i32 to vector<16x8xi32>
    %37 = arith.addi %35, %36 : vector<16x8xi32>
    %38 = vector.shape_cast %37 : vector<16x8xi32> to vector<16x8x1xi32>
    %39 = vector.broadcast %27 : vector<1x8x48xi32> to vector<16x8x48xi32>
    %40 = vector.broadcast %38 : vector<16x8x1xi32> to vector<16x8x48xi32>
    %41 = arith.cmpi eq, %39, %40 : vector<16x8x48xi32>
    %42 = arith.ori %33, %41 : vector<16x8x48xi1>
    %43 = arith.extui %42 : vector<16x8x48xi1> to vector<16x8x48xi32>
    %44 = arith.sitofp %43 : vector<16x8x48xi32> to vector<16x8x48xf32>
    %cst = arith.constant dense<0.000000e+00> : vector<16x64xf32>
    %45 = tpu.matmul %12, %1, %cst {dimension_numbers = #tpu.dot_dimension_numbers<[1], [0], [0], [1], [0, 0, 1, 1], [], []>} : vector<16x48xf32>, vector<48x64xf32>, vector<16x64xf32> -> vector<16x64xf32>
    %cst_8 = arith.constant dense<0.000000e+00> : vector<16x64xf32>
    %46 = tpu.matmul %25, %1, %cst_8 {dimension_numbers = #tpu.dot_dimension_numbers<[1], [0], [0], [1], [0, 0, 1, 1], [], []>} : vector<16x48xf32>, vector<48x64xf32>, vector<16x64xf32> -> vector<16x64xf32>
    %47 = vector.shape_cast %44 : vector<16x8x48xf32> to vector<128x48xf32>
    %cst_9 = arith.constant dense<0.000000e+00> : vector<128x64xf32>
    %48 = tpu.matmul %47, %1, %cst_9 {dimension_numbers = #tpu.dot_dimension_numbers<[1], [0], [0], [1], [0, 0, 1, 1], [], []>} : vector<128x48xf32>, vector<48x64xf32>, vector<128x64xf32> -> vector<128x64xf32>
    %49 = vector.shape_cast %48 : vector<128x64xf32> to vector<16x8x64xf32>
    %50 = tpu.iota {dimensions = array<i32: 1>} : vector<16x8xi32>
    %51 = vector.broadcast %7 : vector<16x1xi32> to vector<16x8xi32>
    %52 = arith.cmpi slt, %50, %51 : vector<16x8xi32>
    %53 = arith.extui %52 : vector<16x8xi1> to vector<16x8xi32>
    %54 = arith.sitofp %53 : vector<16x8xi32> to vector<16x8xf32>
    %55 = arith.sitofp %7 : vector<16x1xi32> to vector<16x1xf32>
    %c0_10 = arith.constant 0 : index
    %c0_11 = arith.constant 0 : index
    %56 = vector.load %arg3[%c0_10, %c0_11] : memref<712x128xf32, #tpu.memory_space<vmem>>, vector<64x128xf32>
    %c64 = arith.constant 64 : index
    %c0_12 = arith.constant 0 : index
    %57 = vector.load %arg3[%c64, %c0_12] : memref<712x128xf32, #tpu.memory_space<vmem>>, vector<64x128xf32>
    %c128 = arith.constant 128 : index
    %c0_13 = arith.constant 0 : index
    %58 = vector.load %arg3[%c128, %c0_13] : memref<712x128xf32, #tpu.memory_space<vmem>>, vector<64x128xf32>
    %c192 = arith.constant 192 : index
    %c0_14 = arith.constant 0 : index
    %59 = vector.load %arg3[%c192, %c0_14] : memref<712x128xf32, #tpu.memory_space<vmem>>, vector<128x128xf32>
    %c320 = arith.constant 320 : index
    %c0_15 = arith.constant 0 : index
    %60 = vector.load %arg3[%c320, %c0_15] : memref<712x128xf32, #tpu.memory_space<vmem>>, vector<256x128xf32>
    %c576 = arith.constant 576 : index
    %c0_16 = arith.constant 0 : index
    %61 = vector.load %arg3[%c576, %c0_16] : memref<712x128xf32, #tpu.memory_space<vmem>>, vector<128x128xf32>
    %c704 = arith.constant 704 : index
    %c0_17 = arith.constant 0 : index
    %62 = vector.load %arg3[%c704, %c0_17] : memref<712x128xf32, #tpu.memory_space<vmem>>, vector<1x128xf32>
    %c705 = arith.constant 705 : index
    %c0_18 = arith.constant 0 : index
    %63 = vector.load %arg3[%c705, %c0_18] : memref<712x128xf32, #tpu.memory_space<vmem>>, vector<1x128xf32>
    %c706 = arith.constant 706 : index
    %c0_19 = arith.constant 0 : index
    %64 = vector.load %arg3[%c706, %c0_19] : memref<712x128xf32, #tpu.memory_space<vmem>>, vector<1x128xf32>
    %c707 = arith.constant 707 : index
    %c0_20 = arith.constant 0 : index
    %65 = vector.load %arg3[%c707, %c0_20] : memref<712x128xf32, #tpu.memory_space<vmem>>, vector<1x128xf32>
    %c708 = arith.constant 708 : index
    %c0_21 = arith.constant 0 : index
    %66 = vector.load %arg3[%c708, %c0_21] : memref<712x128xf32, #tpu.memory_space<vmem>>, vector<1x128xf32>
    %67 = vector.shape_cast %46 : vector<16x64xf32> to vector<16x1x64xf32>
    %68 = vector.broadcast %67 : vector<16x1x64xf32> to vector<16x8x64xf32>
    %69 = arith.mulf %49, %68 : vector<16x8x64xf32>
    %70 = vector.shape_cast %69 : vector<16x8x64xf32> to vector<128x64xf32>
    %cst_22 = arith.constant dense<0.000000e+00> : vector<16x128xf32>
    %71 = tpu.matmul %46, %57, %cst_22 {dimension_numbers = #tpu.dot_dimension_numbers<[1], [0], [0], [1], [0, 0, 1, 1], [], []>} : vector<16x64xf32>, vector<64x128xf32>, vector<16x128xf32> -> vector<16x128xf32>
    %72 = vector.broadcast %62 : vector<1x128xf32> to vector<16x128xf32>
    %73 = arith.addf %71, %72 : vector<16x128xf32>
    %cst_23 = arith.constant dense<0.000000e+00> : vector<128x128xf32>
    %74 = tpu.matmul %48, %56, %cst_23 {dimension_numbers = #tpu.dot_dimension_numbers<[1], [0], [0], [1], [0, 0, 1, 1], [], []>} : vector<128x64xf32>, vector<64x128xf32>, vector<128x128xf32> -> vector<128x128xf32>
    %cst_24 = arith.constant dense<0.000000e+00> : vector<128x128xf32>
    %75 = tpu.matmul %70, %58, %cst_24 {dimension_numbers = #tpu.dot_dimension_numbers<[1], [0], [0], [1], [0, 0, 1, 1], [], []>} : vector<128x64xf32>, vector<64x128xf32>, vector<128x128xf32> -> vector<128x128xf32>
    %76 = arith.addf %74, %75 : vector<128x128xf32>
    %77 = vector.shape_cast %76 : vector<128x128xf32> to vector<16x8x128xf32>
    %78 = vector.shape_cast %73 : vector<16x128xf32> to vector<16x1x128xf32>
    %79 = vector.broadcast %78 : vector<16x1x128xf32> to vector<16x8x128xf32>
    %80 = arith.addf %77, %79 : vector<16x8x128xf32>
    %cst_25 = arith.constant 5.000000e-01 : f32
    %81 = vector.broadcast %cst_25 : f32 to vector<16x8x128xf32>
    %82 = arith.mulf %81, %80 : vector<16x8x128xf32>
    %83 = math.tanh %82 : vector<16x8x128xf32>
    %cst_26 = arith.constant 1.000000e+00 : f32
    %84 = vector.broadcast %cst_26 : f32 to vector<16x8x128xf32>
    %85 = arith.addf %83, %84 : vector<16x8x128xf32>
    %cst_27 = arith.constant 5.000000e-01 : f32
    %86 = vector.broadcast %cst_27 : f32 to vector<16x8x128xf32>
    %87 = arith.mulf %86, %85 : vector<16x8x128xf32>
    %88 = vector.shape_cast %87 : vector<16x8x128xf32> to vector<128x128xf32>
    %cst_28 = arith.constant dense<0.000000e+00> : vector<128x128xf32>
    %89 = tpu.matmul %88, %59, %cst_28 {dimension_numbers = #tpu.dot_dimension_numbers<[1], [0], [0], [1], [0, 0, 1, 1], [], []>} : vector<128x128xf32>, vector<128x128xf32>, vector<128x128xf32> -> vector<128x128xf32>
    %90 = vector.broadcast %63 : vector<1x128xf32> to vector<128x128xf32>
    %91 = arith.addf %89, %90 : vector<128x128xf32>
    %cst_29 = arith.constant 5.000000e-01 : f32
    %92 = vector.broadcast %cst_29 : f32 to vector<128x128xf32>
    %93 = arith.mulf %92, %91 : vector<128x128xf32>
    %94 = math.tanh %93 : vector<128x128xf32>
    %cst_30 = arith.constant 1.000000e+00 : f32
    %95 = vector.broadcast %cst_30 : f32 to vector<128x128xf32>
    %96 = arith.addf %94, %95 : vector<128x128xf32>
    %cst_31 = arith.constant 5.000000e-01 : f32
    %97 = vector.broadcast %cst_31 : f32 to vector<128x128xf32>
    %98 = arith.mulf %97, %96 : vector<128x128xf32>
    %99 = vector.shape_cast %98 : vector<128x128xf32> to vector<16x8x128xf32>
    %100 = vector.shape_cast %64 : vector<1x128xf32> to vector<1x1x128xf32>
    %101 = vector.broadcast %100 : vector<1x1x128xf32> to vector<16x8x128xf32>
    %102 = arith.mulf %99, %101 : vector<16x8x128xf32>
    %cst_32 = arith.constant dense<0.000000e+00> : vector<16x8xf32>
    %103 = vector.multi_reduction <add>, %102, %cst_32 [2] : vector<16x8x128xf32> to vector<16x8xf32>
    %cst_33 = arith.constant -2.14748365E+9 : f32
    %104 = vector.broadcast %cst_33 : f32 to vector<16x8xf32>
    %105 = arith.select %52, %103, %104 : vector<16x8xi1>, vector<16x8xf32>
    %cst_34 = arith.constant dense<0xFF800000> : vector<16xf32>
    %106 = vector.multi_reduction <maximumf>, %105, %cst_34 [1] : vector<16x8xf32> to vector<16xf32>
    %107 = vector.shape_cast %106 : vector<16xf32> to vector<16x1xf32>
    %108 = vector.broadcast %107 : vector<16x1xf32> to vector<16x8xf32>
    %109 = arith.subf %105, %108 : vector<16x8xf32>
    %110 = math.exp %109 : vector<16x8xf32>
    %cst_35 = arith.constant dense<0.000000e+00> : vector<16xf32>
    %111 = vector.multi_reduction <add>, %110, %cst_35 [1] : vector<16x8xf32> to vector<16xf32>
    %112 = vector.shape_cast %111 : vector<16xf32> to vector<16x1xf32>
    %113 = tpu.reciprocal %112 {approx = true} : vector<16x1xf32> -> vector<16x1xf32>
    %114 = vector.broadcast %113 : vector<16x1xf32> to vector<16x8xf32>
    %115 = arith.mulf %110, %114 : vector<16x8xf32>
    %116 = arith.mulf %115, %54 : vector<16x8xf32>
    %117 = vector.shape_cast %54 : vector<16x8xf32> to vector<16x8x1xf32>
    %118 = vector.broadcast %117 : vector<16x8x1xf32> to vector<16x8x64xf32>
    %119 = arith.mulf %118, %49 : vector<16x8x64xf32>
    %cst_36 = arith.constant dense<0.000000e+00> : vector<16x64xf32>
    %120 = vector.multi_reduction <add>, %119, %cst_36 [1] : vector<16x8x64xf32> to vector<16x64xf32>
    %121 = tpu.reciprocal %55 {approx = true} : vector<16x1xf32> -> vector<16x1xf32>
    %122 = vector.broadcast %121 : vector<16x1xf32> to vector<16x64xf32>
    %123 = arith.mulf %120, %122 : vector<16x64xf32>
    %124 = vector.shape_cast %116 : vector<16x8xf32> to vector<16x8x1xf32>
    %125 = vector.broadcast %124 : vector<16x8x1xf32> to vector<16x8x64xf32>
    %126 = arith.mulf %125, %49 : vector<16x8x64xf32>
    %cst_37 = arith.constant dense<0.000000e+00> : vector<16x64xf32>
    %127 = vector.multi_reduction <add>, %126, %cst_37 [1] : vector<16x8x64xf32> to vector<16x64xf32>
    %c0_38 = arith.constant 0 : index
    %c0_39 = arith.constant 0 : index
    %128 = vector.load %arg4[%c0_38, %c0_39] : memref<264x256xf32, #tpu.memory_space<vmem>>, vector<64x256xf32>
    %cst_40 = arith.constant dense<0.000000e+00> : vector<16x256xf32>
    %129 = tpu.matmul %45, %128, %cst_40 {dimension_numbers = #tpu.dot_dimension_numbers<[1], [0], [0], [1], [0, 0, 1, 1], [], []>} : vector<16x64xf32>, vector<64x256xf32>, vector<16x256xf32> -> vector<16x256xf32>
    %c64_41 = arith.constant 64 : index
    %c0_42 = arith.constant 0 : index
    %130 = vector.load %arg4[%c64_41, %c0_42] : memref<264x256xf32, #tpu.memory_space<vmem>>, vector<64x256xf32>
    %cst_43 = arith.constant dense<0.000000e+00> : vector<16x256xf32>
    %131 = tpu.matmul %46, %130, %cst_43 {dimension_numbers = #tpu.dot_dimension_numbers<[1], [0], [0], [1], [0, 0, 1, 1], [], []>} : vector<16x64xf32>, vector<64x256xf32>, vector<16x256xf32> -> vector<16x256xf32>
    %132 = arith.addf %129, %131 : vector<16x256xf32>
    %c128_44 = arith.constant 128 : index
    %c0_45 = arith.constant 0 : index
    %133 = vector.load %arg4[%c128_44, %c0_45] : memref<264x256xf32, #tpu.memory_space<vmem>>, vector<64x256xf32>
    %cst_46 = arith.constant dense<0.000000e+00> : vector<16x256xf32>
    %134 = tpu.matmul %123, %133, %cst_46 {dimension_numbers = #tpu.dot_dimension_numbers<[1], [0], [0], [1], [0, 0, 1, 1], [], []>} : vector<16x64xf32>, vector<64x256xf32>, vector<16x256xf32> -> vector<16x256xf32>
    %135 = arith.addf %132, %134 : vector<16x256xf32>
    %c192_47 = arith.constant 192 : index
    %c0_48 = arith.constant 0 : index
    %136 = vector.load %arg4[%c192_47, %c0_48] : memref<264x256xf32, #tpu.memory_space<vmem>>, vector<64x256xf32>
    %cst_49 = arith.constant dense<0.000000e+00> : vector<16x256xf32>
    %137 = tpu.matmul %127, %136, %cst_49 {dimension_numbers = #tpu.dot_dimension_numbers<[1], [0], [0], [1], [0, 0, 1, 1], [], []>} : vector<16x64xf32>, vector<64x256xf32>, vector<16x256xf32> -> vector<16x256xf32>
    %138 = arith.addf %135, %137 : vector<16x256xf32>
    %c256 = arith.constant 256 : index
    %c0_50 = arith.constant 0 : index
    %139 = vector.load %arg4[%c256, %c0_50] : memref<264x256xf32, #tpu.memory_space<vmem>>, vector<1x256xf32>
    %140 = vector.broadcast %139 : vector<1x256xf32> to vector<16x256xf32>
    %141 = arith.addf %138, %140 : vector<16x256xf32>
    %cst_51 = arith.constant 0.000000e+00 : f32
    %142 = vector.broadcast %cst_51 : f32 to vector<16x256xf32>
    %143 = arith.maximumf %141, %142 : vector<16x256xf32>
    %cst_52 = arith.constant dense<0.000000e+00> : vector<16x128xf32>
    %144 = tpu.matmul %143, %60, %cst_52 {dimension_numbers = #tpu.dot_dimension_numbers<[1], [0], [0], [1], [0, 0, 1, 1], [], []>} : vector<16x256xf32>, vector<256x128xf32>, vector<16x128xf32> -> vector<16x128xf32>
    %145 = vector.broadcast %65 : vector<1x128xf32> to vector<16x128xf32>
    %146 = arith.addf %144, %145 : vector<16x128xf32>
    %cst_53 = arith.constant 0.000000e+00 : f32
    %147 = vector.broadcast %cst_53 : f32 to vector<16x128xf32>
    %148 = arith.maximumf %146, %147 : vector<16x128xf32>
    %cst_54 = arith.constant dense<0.000000e+00> : vector<16x128xf32>
    %149 = tpu.matmul %148, %61, %cst_54 {dimension_numbers = #tpu.dot_dimension_numbers<[1], [0], [0], [1], [0, 0, 1, 1], [], []>} : vector<16x128xf32>, vector<128x128xf32>, vector<16x128xf32> -> vector<16x128xf32>
    %150 = vector.broadcast %66 : vector<1x128xf32> to vector<16x128xf32>
    %151 = arith.addf %149, %150 : vector<16x128xf32>
    %c0_55 = arith.constant 0 : index
    %c0_56 = arith.constant 0 : index
    %152 = vector.load %arg5[%c0_55, %c0_56] : memref<16x128xf32, #tpu.memory_space<vmem>>, vector<16x128xf32>
    tpu.vector_store %arg5[%c0_55, %c0_56], %151 {strides = array<i32>} : memref<16x128xf32, #tpu.memory_space<vmem>>, vector<16x128xf32>,
    return
  }
  func.func @transform_0(%arg0: i32) -> (i32, i32) {
    %c0_i32 = arith.constant 0 : i32
    %c0_i32_0 = arith.constant 0 : i32
    return %arg0, %c0_i32 : i32, i32
  }
  func.func @transform_1(%arg0: i32) -> (i32, i32) {
    %c0_i32 = arith.constant 0 : i32
    %c0_i32_0 = arith.constant 0 : i32
    %c0_i32_1 = arith.constant 0 : i32
    return %c0_i32, %c0_i32_0 : i32, i32
  }
  func.func @transform_2(%arg0: i32) -> (i32, i32) {
    %c0_i32 = arith.constant 0 : i32
    %c0_i32_0 = arith.constant 0 : i32
    %c0_i32_1 = arith.constant 0 : i32
    return %c0_i32, %c0_i32_0 : i32, i32
  }
  func.func @transform_3(%arg0: i32) -> (i32, i32) {
    %c0_i32 = arith.constant 0 : i32
    %c0_i32_0 = arith.constant 0 : i32
    %c0_i32_1 = arith.constant 0 : i32
    return %c0_i32, %c0_i32_0 : i32, i32
  }
  func.func @transform_4(%arg0: i32) -> (i32, i32) {
    %c0_i32 = arith.constant 0 : i32
    %c0_i32_0 = arith.constant 0 : i32
    return %arg0, %c0_i32 : i32, i32
  }
}

</mosaic_0001>

<bundles_post_ra>
// kernel: tpu_custom_call.1
= control target key start
LH: loop header
LB: loop body
LE: loop exit
PB: predicated region body
PF: predicated region fallthrough
CT: control target
= control target key end

     0   :  { %9 = vsyncpa [#allocation3], 0  ;;  %s3490_s0 = inlined_call_operand.hbm [shape: s32[16,20], index: 0, kind: input, shape index: {}]   ;;  %s3491_s1 = inlined_call_operand.hbm [shape: f32[48,64], index: 1, kind: input, shape index: {}]   ;;  %s3492_s2 = inlined_call_operand.hbm [shape: f32[712,128], index: 2, kind: input, shape index: {}]   ;;  %s3493_s3 = inlined_call_operand.hbm [shape: f32[264,256], index: 3, kind: input, shape index: {}]   ;;  %s3494_s4 = inlined_call_operand.hbm [shape: f32[16,128], index: 4, kind: output, shape index: {}]  }
   0x1   :  { %10 = vsyncpa [#allocation6], 0 }
   0x2   :  { %11 = vsyncpa [#allocation9], 0 }
   0x3   :  { %12 = vsyncpa [#allocation4], 0  ;;  %s30_s17 = sshll.u32 %s3491_s1, 4  ;;  %s2799_s18 = smov [#allocation5]   ;;  %s31_s17 = int_to_ptr.hbm [resolvable:$true] %s30_s17 }
   0x4   :  { %s32_s19 = sshll.u32 %s2799_s18, 4  ;;  %s17_s22 = sshll.u32 %s3490_s0, 4  ;;  %s33_s19 = int_to_ptr.vmem [resolvable:$true] %s32_s19  ;;  %s18_s22 = int_to_ptr.hbm [resolvable:$true] %s17_s22 }
   0x5   :  { %s2800_s23 = smov 128   ;;  %s2801_s24 = smov 8  }
   0x6   :  { %38 = dma.hbm_to_vmem [thread:$0]  %s31_s17, 768, %s33_s19, [#allocation6], %s2800_s23, %s2800_s23, %s2801_s24  }
   0x7   :  { %s2802_s25 = smov [#allocation2]   ;;  %s43_s1 = sshll.u32 %s3492_s2, 4  ;;  %s44_s1 = int_to_ptr.hbm [resolvable:$true] %s43_s1 }
   0x8   :  { %s19_s26 = sshll.u32 %s2802_s25, 4  ;;  %s56_s30 = sshll.u32 %s3493_s3, 4  ;;  %s20_s26 = int_to_ptr.vmem [resolvable:$true] %s19_s26  ;;  %s57_s30 = int_to_ptr.hbm [resolvable:$true] %s56_s30 }
   0x9   :  { %25 = dma.hbm_to_vmem [thread:$0]  %s18_s22, 256, %s20_s26, [#allocation3], %s2800_s23, %s2800_s23, %s2801_s24  }
   0xa   :  { %s2803_s5 = smov [#allocation7]   ;;  %s2804_s7 = smov [#allocation8]  }
   0xb   :  { %s45_s6 = sshll.u32 %s2803_s5, 4  ;;  %s58_s2 = sshll.u32 %s2804_s7, 4  ;;  %s46_s6 = int_to_ptr.vmem [resolvable:$true] %s45_s6  ;;  %s59_s2 = int_to_ptr.vmem [resolvable:$true] %s58_s2 }
   0xc   :  { %51 = dma.hbm_to_vmem [thread:$0]  %s44_s1, 11392, %s46_s6, [#allocation6], %s2800_s23, %s2800_s23, %s2801_s24  }
   0xd   :  { %s2805_s8 = smov 256   ;;  %s2806_s9 = smov 16  }
   0xe   :  { %64 = dma.hbm_to_vmem [thread:$0]  %s57_s30, 8448, %s59_s2, [#allocation9], %s2805_s8, %s2805_s8, %s2806_s9  }
   0xf   :  { %2791 = dma.done.wait [#allocation3], 256  }
  0x10   :  { %2792 = vsyncadd [#allocation3], 4294967040 }
  0x11   :  { %2793 = dma.done.wait [#allocation6], 12160  }
  0x12   :  { %2794 = vsyncadd [#allocation6], 4294955136 }
  0x13   :  { %2795 = dma.done.wait [#allocation9], 8448  }
  0x14   :  { %2796 = vsyncadd [#allocation9], 4294958848  ;;  %v89_v0 = vlaneseq  ;;  %v2807_v1 = vmov 1   ;;  %v2867_v4 = vld [vmem:[#allocation2] sm:$0xff]  ;;  %v2808_v10 = vmov 2   ;;  %v2880_v20 = vld [vmem:[#allocation2 + $0x8] sm:$0xff] }
  0x15   :  { %2517 = vset.pattern.permute.xlu0 %v2807_v1  ;;  %v103_v5 = vadd.s32 16, %v2867_v4  ;;  %v2883_v21 = vadd.s32 16, %v2880_v20  ;;  %v88_v30 = vld [vmem:[#allocation5 + $0x28] sm:$0xff]  ;;  %v87_v31 = vld [vmem:[#allocation5 + $0x20] sm:$0xff]  ;;  %v86_v33 = vld [vmem:[#allocation5 + $0x18] sm:$0xff]  ;;  %vm433_vm2 = vcmask 392192  }
  0x16   :  { %v2860_v2 = vshrl.u32 %v89_v0, 7  ;;  %479 = vmatpush.msra.mxu1 %v88_v30  ;;  %550 = vmatpush.msra.mxu2 %v88_v30  ;;  %v85_v35 = vld [vmem:[#allocation5 + $0x10] sm:$0xff]  ;;  %v84_v36 = vld [vmem:[#allocation5 + $0x8] sm:$0xff]  ;;  %v83_v37 = vld [vmem:[#allocation5] sm:$0xff]  ;;  %v2907_v43 = vand.u32 127, %v89_v0  ;;  %v2809_v49 = vmov 0.0  }
  0x17   :  { %v129_v6 = vperm.slane %v103_v5, 0  ;;  %v136_v7 = vperm.slane %v103_v5, 1  ;;  %106 = vperm.xlu0 %2517, %v103_v5   ;;  %v113_v8 = vadd.s32 16, %v103_v5  ;;  %v150_v13 = vperm.slane %v103_v5, 3  ;;  %450 = vmatpush.msra.mxu3 %v88_v30  ;;  %v625_v30 = vld [vmem:[#allocation7 + $0x30] sm:$0xff]  ;;  %s2812_s3 = smov [#allocation10]  }
  0x18   :  { %v2863_v3 = vadd.s32 3, %v2860_v2  ;;  %v2871_v9 = vadd.s32 11, %v2860_v2  ;;  %v143_v15 = vperm.slane %v103_v5, 2  ;;  %v157_v17 = vperm.slane %v103_v5, 4  ;;  %480 = vmatpush.msra.mxu1 %v87_v31  ;;  %551 = vmatpush.msra.mxu2 %v87_v31  ;;  %s2394_s10 = sshll.u32 %s2812_s3, 4  ;;  %s2396_s13 = sshll.u32 %s3494_s4, 4  ;;  %s2395_s10 = int_to_ptr.vmem [resolvable:$true] %s2394_s10  ;;  %s2397_s13 = int_to_ptr.hbm [resolvable:$true] %s2396_s13 }
  0x19   :  { %v257_v11 = vperm.slane %v113_v8, 0  ;;  %v264_v12 = vperm.slane %v113_v8, 1  ;;  %v271_v14 = vperm.slane %v113_v8, 2  ;;  %v292_v16 = vperm.slane %v113_v8, 5  ;;  %451 = vmatpush.msra.mxu3 %v87_v31  ;;  %v641_v31 = vld [vmem:[#allocation7 + $0xb0] sm:$0xff] }
  0x1a   :  { %2519 = vset.pattern.permute.xlu1 %v2863_v3  ;;  %2521 = vset.pattern.permute.xlu2 %v2863_v3  ;;  %v278_v18 = vperm.slane %v113_v8, 3  ;;  %v164_v19 = vperm.slane %v103_v5, 5  ;;  %v285_v22 = vperm.slane %v113_v8, 4  ;;  %v299_v23 = vperm.slane %v113_v8, 6 }
  0x1b   :  { %v2889_v24 = vadd.s32 16, %v2883_v21  ;;  %v171_v26 = vperm.slane %v103_v5, 6  ;;  %v306_v27 = vperm.slane %v113_v8, 7  ;;  %v178_v28 = vperm.slane %v103_v5, 7  ;;  %481 = vmatpush.msra.mxu1 %v86_v33  ;;  %552 = vmatpush.msra.mxu2 %v86_v33 }
  0x1c   :  { %v185_v29 = vperm.slane %v2883_v21, 0  ;;  %v213_v32 = vperm.slane %v2883_v21, 4  ;;  %v192_v34 = vperm.slane %v2883_v21, 1  ;;  %452 = vmatpush.msra.mxu3 %v86_v33  ;;  %v227_v39 = vperm.slane %v2883_v21, 6  ;;  %v630_v33 = vld [vmem:[#allocation7 + $0x58] sm:$0xff] }
  0x1d   :  { %v320_v25 = vperm.slane %v2889_v24, 1  ;;  %482 = vmatpush.msra.mxu1 %v85_v35  ;;  %553 = vmatpush.msra.mxu2 %v85_v35  ;;  %v313_v38 = vperm.slane %v2889_v24, 0  ;;  %v327_v40 = vperm.slane %v2889_v24, 2  ;;  %v234_v42 = vperm.slane %v2883_v21, 7 }
  0x1e   :  { %453 = vmatpush.msra.mxu3 %v85_v35  ;;  %v334_v44 = vperm.slane %v2889_v24, 3  ;;  %v199_v45 = vperm.slane %v2883_v21, 2  ;;  %v206_v51 = vperm.slane %v2883_v21, 3  ;;  %v220_v54 = vperm.slane %v2883_v21, 5 }
  0x1f   :  { %2518 = vset.pattern.permute.xlu0 %v2808_v10  ;;  %483 = vmatpush.msra.mxu1 %v84_v36  ;;  %v341_v58 = vperm.slane %v2889_v24, 4  ;;  %v2810_v59 = vmov 0   ;;  %v348_v63 = vperm.slane %v2889_v24, 5  ;;  %v355_v0 = vperm.slane %v2889_v24, 6 }
  0x20   :  { %116 = vperm.xlu0 %2518, %v113_v8   ;;  %554 = vmatpush.msra.mxu2 %v84_v36 }
  0x21   :  { %454 = vmatpush.msra.mxu3 %v84_v36  ;;  %484 = vmatpush.msra.mxu1 %v83_v37  ;;  %v623_v36 = vld [vmem:[#allocation7 + $0x20] sm:$0xff] }
  0x22   :  { %134 = vperm.xlu1 %2519, %v129_v6   ;;  %141 = vperm.xlu2 %2521, %v136_v7   ;;  %v362_v6 = vperm.slane %v2889_v24, 7 }
  0x23   :  { %555 = vmatpush.msra.mxu2 %v83_v37  ;;  %455 = vmatpush.msra.mxu3 %v83_v37  ;;  %v629_v37 = vld [vmem:[#allocation7 + $0x50] sm:$0xff] }
  0x28   :  { %2524 = vset.pattern.permute.xlu0 %v2863_v3 }
  0x2a   :  { %2520 = vset.pattern.permute.xlu1 %v2871_v9  ;;  %2522 = vset.pattern.permute.xlu2 %v2871_v9 }
  0x30   :  { %155 = vperm.xlu0 %2524, %v150_v13  }
  0x32   :  { %262 = vperm.xlu1 %2520, %v257_v11   ;;  %269 = vperm.xlu2 %2522, %v264_v12  }
  0x38   :  { %2527 = vset.pattern.permute.xlu0 %v2871_v9 }
  0x3a   :  { %2523 = vset.pattern.permute.xlu1 %v2863_v3  ;;  %276 = vperm.xlu2 %2522, %v271_v14  }
  0x40   :  { %297 = vperm.xlu0 %2527, %v292_v16  }
  0x42   :  { %148 = vperm.xlu1 %2523, %v143_v15   ;;  %2526 = vset.pattern.permute.xlu2 %v2863_v3 }
  0x48   :  { %2530 = vset.pattern.permute.xlu0 %v2807_v1 }
  0x49   :  { %109 = vperm.xlu0 %2530, %v2883_v21  }
  0x4a   :  { %2525 = vset.pattern.permute.xlu1 %v2871_v9  ;;  %162 = vperm.xlu2 %2526, %v157_v17  }
  0x51   :  { %2534 = vset.pattern.permute.xlu0 %v2871_v9 }
  0x52   :  { %283 = vperm.xlu1 %2525, %v278_v18   ;;  %169 = vperm.xlu2 %2526, %v164_v19  }
  0x59   :  { %325 = vperm.xlu0 %2534, %v320_v25   ;;  %v632_v25 = vld [vmem:[#allocation7 + $0x68] sm:$0xff] }
  0x5a   :  { %290 = vperm.xlu1 %2525, %v285_v22   ;;  %2529 = vset.pattern.permute.xlu2 %v2871_v9 }
  0x61   :  { %2537 = vset.pattern.permute.xlu0 %v2863_v3 }
  0x62   :  { %2528 = vset.pattern.permute.xlu1 %v2863_v3  ;;  %304 = vperm.xlu2 %2529, %v299_v23   ;;  %v634_v23 = vld [vmem:[#allocation7 + $0x78] sm:$0xff] }
  0x63   :  { %790 = vmatpush.msrb.mxu3 %v634_v23 }
  0x69   :  { %218 = vperm.xlu0 %2537, %v213_v32   ;;  %v624_v32 = vld [vmem:[#allocation7 + $0x28] sm:$0xff] }
  0x6a   :  { %176 = vperm.xlu1 %2528, %v171_v26   ;;  %311 = vperm.xlu2 %2529, %v306_v27   ;;  %v626_v26 = vld [vmem:[#allocation7 + $0x38] sm:$0xff] }
  0x6b   :  { %974 = vmatpush.msrb.mxu1 %v626_v26 }
  0x6d   :  { %975 = vmatpush.msrb.mxu1 %v625_v30 }
  0x6f   :  { %976 = vmatpush.msrb.mxu1 %v624_v32 }
  0x71   :  { %232 = vperm.xlu0 %2537, %v227_v39   ;;  %v639_v39 = vld [vmem:[#allocation7 + $0xa0] sm:$0xff]  ;;  %977 = vmatpush.msrb.mxu1 %v623_v36 }
  0x72   :  { %183 = vperm.xlu1 %2528, %v178_v28   ;;  %2532 = vset.pattern.permute.xlu2 %v2863_v3  ;;  %v631_v28 = vld [vmem:[#allocation7 + $0x60] sm:$0xff] }
  0x79   :  { %239 = vperm.xlu0 %2537, %v234_v42   ;;  %v628_v42 = vld [vmem:[#allocation7 + $0x48] sm:$0xff] }
  0x7a   :  { %2531 = vset.pattern.permute.xlu1 %v2808_v10  ;;  %190 = vperm.xlu2 %2532, %v185_v29   ;;  %v642_v29 = vld [vmem:[#allocation7 + $0xb8] sm:$0xff] }
  0x7b   :  { %119 = vperm.xlu1 %2531, %v2889_v24   ;;  %v633_v24 = vld [vmem:[#allocation7 + $0x70] sm:$0xff]  ;;  %861 = vmatpush.msra.mxu0 %v642_v29 }
  0x7c   :  { %v142_v48 = vpop.permute.xlu2 %141  ;;  %791 = vmatpush.msrb.mxu3 %v633_v24 }
  0x7d   :  { %vm242_vm7 = vcmp.eq.s32.totalorder %v2907_v43, %v142_v48  ;;  %862 = vmatpush.msra.mxu0 %v641_v31 }
  0x7e   :  { %792 = vmatpush.msrb.mxu3 %v632_v25 }
  0x80   :  { %793 = vmatpush.msrb.mxu3 %v631_v28 }
  0x81   :  { %2554 = vset.pattern.permute.xlu0 %v2860_v2 }
  0x82   :  { %197 = vperm.xlu2 %2532, %v192_v34   ;;  %v640_v34 = vld [vmem:[#allocation7 + $0xa8] sm:$0xff]  ;;  %794 = vmatpush.msrb.mxu3 %v630_v33 }
  0x83   :  { %2533 = vset.pattern.permute.xlu1 %v2871_v9  ;;  %863 = vmatpush.msra.mxu0 %v640_v34 }
  0x84   :  { %795 = vmatpush.msrb.mxu3 %v629_v37 }
  0x85   :  { %864 = vmatpush.msra.mxu0 %v639_v39 }
  0x86   :  { %796 = vmatpush.msrb.mxu3 %v628_v42 }
  0x89   :  { %v107_v41 = vpop.permute.xlu0 %106 }
  0x8a   :  { %2536 = vset.pattern.permute.xlu2 %v2871_v9  ;;  %vm111_vm0 = vcmp.eq.s32.totalorder %v2907_v43, %v107_v41 }
  0x8b   :  { %318 = vperm.xlu1 %2533, %v313_v38  }
  0x8c   :  { %v270_v53 = vpop.permute.xlu2 %269 }
  0x8d   :  { %vm370_vm8 = vcmp.eq.s32.totalorder %v2907_v43, %v270_v53  ;;  %v619_v53 = vld [vmem:[#allocation7] sm:$0xff] }
  0x8e   :  { %vm386_vm9 = vmor %vm242_vm7, %vm370_vm8 }
  0x8f   :  { %v2416_v57 = vsel %vm386_vm9, 1.0, %v2809_v49 }
  0x92   :  { %332 = vperm.xlu2 %2536, %v327_v40   ;;  %v117_v46 = vpop.permute.xlu0 %116  ;;  %v622_v40 = vld [vmem:[#allocation7 + $0x18] sm:$0xff] }
  0x93   :  { %2535 = vset.pattern.permute.xlu1 %v2863_v3  ;;  %vm121_vm1 = vcmp.eq.s32.totalorder %v2907_v43, %v117_v46  ;;  %978 = vmatpush.msrb.mxu1 %v622_v40  ;;  %v638_v46 = vld [vmem:[#allocation7 + $0x98] sm:$0xff] }
  0x94   :  { %vm123_vm3 = vmor %vm111_vm0, %vm121_vm1  ;;  %v135_v47 = vpop.permute.xlu1 %134  ;;  %v277_v56 = vpop.permute.xlu2 %276  ;;  %865 = vmatpush.msra.mxu0 %v638_v46 }
  0x95   :  { %v2413_v50 = vsel %vm123_vm3, 1.0, %v2809_v49  ;;  %vm241_vm4 = vcmp.eq.s32.totalorder %v2907_v43, %v135_v47  ;;  %vm371_vm10 = vcmp.eq.s32.totalorder %v2907_v43, %v277_v56  ;;  %v621_v47 = vld [vmem:[#allocation7 + $0x10] sm:$0xff] }
  0x96   :  { %2433 = vmatmul.msk.f32.vlgmr.msra.gmra.mxu1 %vm433_vm2, %v2413_v50  ;;  %v637_v50 = vld [vmem:[#allocation7 + $0x90] sm:$0xff] }
  0x97   :  { %979 = vmatpush.msrb.mxu1 %v621_v47  ;;  %866 = vmatpush.msra.mxu0 %v637_v50 }
  0x9a   :  { %339 = vperm.xlu2 %2536, %v334_v44   ;;  %v627_v44 = vld [vmem:[#allocation7 + $0x40] sm:$0xff] }
  0x9b   :  { %204 = vperm.xlu1 %2535, %v199_v45   ;;  %797 = vmatpush.msrb.mxu3 %v627_v44 }
  0xa2   :  { %2539 = vset.pattern.permute.xlu2 %v2863_v3  ;;  %v156_v1 = vpop.permute.xlu0 %155 }
  0xa3   :  { %211 = vperm.xlu1 %2535, %v206_v51   ;;  %vm244_vm13 = vcmp.eq.s32.totalorder %v2907_v43, %v156_v1  ;;  %v620_v51 = vld [vmem:[#allocation7 + $0x8] sm:$0xff] }
  0xa4   :  { %v263_v52 = vpop.permute.xlu1 %262  ;;  %v163_v61 = vpop.permute.xlu2 %162  ;;  %980 = vmatpush.msrb.mxu1 %v620_v51 }
  0xa5   :  { %vm369_vm5 = vcmp.eq.s32.totalorder %v2907_v43, %v263_v52  ;;  %vm245_vm0 = vcmp.eq.s32.totalorder %v2907_v43, %v163_v61  ;;  %v636_v52 = vld [vmem:[#allocation7 + $0x88] sm:$0xff] }
  0xa6   :  { %vm385_vm6 = vmor %vm241_vm4, %vm369_vm5  ;;  %867 = vmatpush.msra.mxu0 %v636_v52  ;;  %981 = vmatpush.msrb.mxu1 %v619_v53 }
  0xa7   :  { %v2415_v55 = vsel %vm385_vm6, 1.0, %v2809_v49 }
  0xa8   :  { %2435 = vmatmul.msk.f32.vlgmr.msra.gmra.mxu2 %vm433_vm2, %v2415_v55 }
  0xaa   :  { %225 = vperm.xlu2 %2539, %v220_v54   ;;  %v635_v54 = vld [vmem:[#allocation7 + $0x80] sm:$0xff] }
  0xab   :  { %2538 = vset.pattern.permute.xlu1 %v2871_v9  ;;  %868 = vmatpush.msra.mxu0 %v635_v54  ;;  %v658_v54 = vld [vmem:[#allocation7 + $0x138] sm:$0xff] }
  0xac   :  { %v170_v3 = vpop.permute.xlu2 %169 }
  0xad   :  { %vm246_vm5 = vcmp.eq.s32.totalorder %v2907_v43, %v170_v3  ;;  %v1982_v3 = vld [vmem:[#allocation8 + $0xd0] sm:$0xff] }
  0xb0   :  { %2436 = vmatmul.msk.f32.gmra.mxu2 %vm433_vm2, %v2416_v57 }
  0xb2   :  { %2540 = vset.pattern.permute.xlu2 %v2810_v59  ;;  %v298_v9 = vpop.permute.xlu0 %297 }
  0xb3   :  { %346 = vperm.xlu1 %2538, %v341_v58   ;;  %92 = vperm.xlu2 %2540, %v2867_v4   ;;  %vm374_vm4 = vcmp.eq.s32.totalorder %v2907_v43, %v298_v9 }
  0xb4   :  { %v149_v60 = vpop.permute.xlu1 %148  ;;  %vm390_vm6 = vmor %vm246_vm5, %vm374_vm4 }
  0xb5   :  { %vm243_vm11 = vcmp.eq.s32.totalorder %v2907_v43, %v149_v60  ;;  %v2420_v12 = vsel %vm390_vm6, 1.0, %v2809_v49 }
  0xb6   :  { %vm387_vm12 = vmor %vm243_vm11, %vm371_vm10 }
  0xb7   :  { %v2417_v62 = vsel %vm387_vm12, 1.0, %v2809_v49 }
  0xb8   :  { %2437 = vmatmul.msk.f32.gmra.mxu2 %vm433_vm2, %v2417_v62 }
  0xbb   :  { %353 = vperm.xlu1 %2538, %v348_v63   ;;  %95 = vperm.xlu2 %2540, %v2880_v20   ;;  %v110_v19 = vpop.permute.xlu0 %109  ;;  %v1986_v63 = vld [vmem:[#allocation8 + $0xf0] sm:$0xff] }
  0xbc   :  { %v305_v7 = vpop.permute.xlu2 %304  ;;  %1996 = vmatpush.msrb.mxu2 %v1986_v63 }
  0xbd   :  { %vm375_vm7 = vcmp.eq.s32.totalorder %v2907_v43, %v305_v7 }
  0xc3   :  { %360 = vperm.xlu1 %2538, %v355_v0   ;;  %v1984_v0 = vld [vmem:[#allocation8 + $0xe0] sm:$0xff] }
  0xc4   :  { %v284_v4 = vpop.permute.xlu1 %283  ;;  %v312_v11 = vpop.permute.xlu2 %311  ;;  %1997 = vmatpush.msrb.mxu2 %v1984_v0 }
  0xc5   :  { %vm372_vm14 = vcmp.eq.s32.totalorder %v2907_v43, %v284_v4  ;;  %vm376_vm10 = vcmp.eq.s32.totalorder %v2907_v43, %v312_v11  ;;  %v1980_v4 = vld [vmem:[#allocation8 + $0xc0] sm:$0xff] }
  0xc6   :  { %vm388_vm15 = vmor %vm244_vm13, %vm372_vm14  ;;  %vm112_vm13 = vcmp.eq.s32.totalorder %v2907_v43, %v110_v19  ;;  %1998 = vmatpush.msrb.mxu2 %v1982_v3  ;;  %v653_v3 = vld [vmem:[#allocation7 + $0x110] sm:$0xff] }
  0xc7   :  { %v2418_v5 = vsel %vm388_vm15, 1.0, %v2809_v49 }
  0xc8   :  { %2438 = vmatmul.msk.f32.gmra.mxu2 %vm433_vm2, %v2418_v5  ;;  %v1978_v5 = vld [vmem:[#allocation8 + $0xb0] sm:$0xff] }
  0xc9   :  { %1999 = vmatpush.msrb.mxu2 %v1980_v4 }
  0xcb   :  { %367 = vperm.xlu1 %2538, %v362_v6   ;;  %v326_v38 = vpop.permute.xlu0 %325  ;;  %v1976_v6 = vld [vmem:[#allocation8 + $0xa0] sm:$0xff]  ;;  %2000 = vmatpush.msrb.mxu2 %v1978_v5 }
  0xcc   :  { %v291_v8 = vpop.permute.xlu1 %290  ;;  %vm378_vm5 = vcmp.eq.s32.totalorder %v2907_v43, %v326_v38  ;;  %v652_v5 = vld [vmem:[#allocation7 + $0x108] sm:$0xff] }
  0xcd   :  { %vm373_vm1 = vcmp.eq.s32.totalorder %v2907_v43, %v291_v8  ;;  %v1974_v8 = vld [vmem:[#allocation8 + $0x90] sm:$0xff]  ;;  %2001 = vmatpush.msrb.mxu2 %v1976_v6  ;;  %v1965_v6 = vld [vmem:[#allocation8 + $0x48] sm:$0xff] }
  0xce   :  { %vm389_vm3 = vmor %vm245_vm0, %vm373_vm1 }
  0xcf   :  { %v2419_v10 = vsel %vm389_vm3, 1.0, %v2809_v49  ;;  %2002 = vmatpush.msrb.mxu2 %v1974_v8  ;;  %v651_v8 = vld [vmem:[#allocation7 + $0x100] sm:$0xff] }
  0xd0   :  { %2439 = vmatmul.msk.f32.gmra.mxu2 %vm433_vm2, %v2419_v10  ;;  %v1972_v10 = vld [vmem:[#allocation8 + $0x80] sm:$0xff] }
  0xd1   :  { %2003 = vmatpush.msrb.mxu2 %v1972_v10 }
  0xd3   :  { %2542 = vset.pattern.permute.xlu1 %v2860_v2 }
  0xd4   :  { %v191_v14 = vpop.permute.xlu2 %190 }
  0xd5   :  { %vm249_vm0 = vcmp.eq.s32.totalorder %v2907_v43, %v191_v14 }
  0xd8   :  { %2440 = vmatmul.msk.f32.gmra.mxu2 %vm433_vm2, %v2420_v12 }
  0xdb   :  { %v219_v7 = vpop.permute.xlu0 %218 }
  0xdc   :  { %v177_v13 = vpop.permute.xlu1 %176  ;;  %v198_v17 = vpop.permute.xlu2 %197 }
  0xdd   :  { %vm247_vm8 = vcmp.eq.s32.totalorder %v2907_v43, %v177_v13  ;;  %vm250_vm4 = vcmp.eq.s32.totalorder %v2907_v43, %v198_v17 }
  0xde   :  { %vm391_vm9 = vmor %vm247_vm8, %vm375_vm7 }
  0xdf   :  { %v2421_v15 = vsel %vm391_vm9, 1.0, %v2809_v49  ;;  %vm394_vm6 = vmor %vm250_vm4, %vm378_vm5 }
  0xe0   :  { %2441 = vmatmul.msk.f32.gmra.mxu2 %vm433_vm2, %v2421_v15  ;;  %v2424_v48 = vsel %vm394_vm6, 1.0, %v2809_v49 }
  0xe3   :  { %v233_v19 = vpop.permute.xlu0 %232 }
  0xe4   :  { %v184_v16 = vpop.permute.xlu1 %183 }
  0xe5   :  { %vm248_vm11 = vcmp.eq.s32.totalorder %v2907_v43, %v184_v16 }
  0xe6   :  { %vm392_vm12 = vmor %vm248_vm11, %vm376_vm10 }
  0xe7   :  { %v2422_v18 = vsel %vm392_vm12, 1.0, %v2809_v49 }
  0xe8   :  { %2442 = vmatmul.msk.f32.gmra.mxu2 %vm433_vm2, %v2422_v18 }
  0xeb   :  { %v240_v26 = vpop.permute.xlu0 %239 }
  0xec   :  { %v2962_v22 = vpop.permute.xlu2 %332 }
  0xed   :  { %v120_v20 = vpop.permute.xlu1 %119  ;;  %vm379_vm7 = vcmp.eq.s32.totalorder %v2907_v43, %v2962_v22 }
  0xee   :  { %vm122_vm14 = vcmp.eq.s32.totalorder %v2907_v43, %v120_v20 }
  0xef   :  { %vm124_vm15 = vmor %vm112_vm13, %vm122_vm14 }
  0xf0   :  { %v2414_v21 = vsel %vm124_vm15, 1.0, %v2809_v49  ;;  %vm777_vm15 = vcmask 523264  }
  0xf1   :  { %2434 = vmatmul.msk.f32.gmra.mxu1 %vm433_vm2, %v2414_v21 }
  0xf4   :  { %v2965_v27 = vpop.permute.xlu2 %339 }
  0xf5   :  { %vm380_vm11 = vcmp.eq.s32.totalorder %v2907_v43, %v2965_v27 }
  0xfd   :  { %v319_v35 = vpop.permute.xlu1 %318 }
  0xfe   :  { %vm377_vm1 = vcmp.eq.s32.totalorder %v2907_v43, %v319_v35 }
  0xff   :  { %vm393_vm3 = vmor %vm249_vm0, %vm377_vm1  ;;  %vm253_vm0 = vcmp.eq.s32.totalorder %v2907_v43, %v219_v7 }
 0x100   :  { %v2423_v41 = vsel %vm393_vm3, 1.0, %v2809_v49 }
 0x101   :  { %2443 = vmatmul.msk.f32.gmra.mxu2 %vm433_vm2, %v2423_v41 }
 0x104   :  { %v2973_v45 = vpop.permute.xlu2 %225 }
 0x105   :  { %vm254_vm4 = vcmp.eq.s32.totalorder %v2907_v43, %v2973_v45 }
 0x109   :  { %2444 = vmatmul.msk.f32.gmra.mxu2 %vm433_vm2, %v2424_v48 }
 0x10d   :  { %v205_v55 = vpop.permute.xlu1 %204  ;;  %v93_v56 = vpop.permute.xlu2 %92 }
 0x10e   :  { %vm251_vm8 = vcmp.eq.s32.totalorder %v2907_v43, %v205_v55  ;;  %vm97_vm9 = vcmp.eq.s32.totalorder %v2907_v43, %v93_v56  ;;  %v657_v55 = vld [vmem:[#allocation7 + $0x130] sm:$0xff]  ;;  %v656_v56 = vld [vmem:[#allocation7 + $0x128] sm:$0xff] }
 0x10f   :  { %vm395_vm10 = vmor %vm251_vm8, %vm379_vm7  ;;  %v2411_v57 = vsel %vm97_vm9, 1.0, %v2809_v49  ;;  %vm255_vm7 = vcmp.eq.s32.totalorder %v2907_v43, %v233_v19  ;;  %v1957_v19 = vld [vmem:[#allocation8 + $0x8] sm:$0xff] }
 0x110   :  { %v2425_v58 = vsel %vm395_vm10, 1.0, %v2809_v49  ;;  %2431 = vmatmul.msk.f32.vlgmr.msra.gmra.mxu3 %vm433_vm2, %v2411_v57  ;;  %vm256_vm10 = vcmp.eq.s32.totalorder %v2907_v43, %v240_v26  ;;  %v1971_v57 = vld [vmem:[#allocation8 + $0x78] sm:$0xff]  ;;  %v646_v26 = vld [vmem:[#allocation7 + $0xd8] sm:$0xff] }
 0x111   :  { %2445 = vmatmul.msk.f32.gmra.mxu2 %vm433_vm2, %v2425_v58  ;;  %1160 = vmatpush.msra.mxu3 %v658_v54  ;;  %v1969_v58 = vld [vmem:[#allocation8 + $0x68] sm:$0xff]  ;;  %v1962_v54 = vld [vmem:[#allocation8 + $0x30] sm:$0xff] }
 0x112   :  { %2071 = vmatpush.msra.mxu2 %v1971_v57  ;;  %v1979_v57 = vld [vmem:[#allocation8 + $0xb8] sm:$0xff] }
 0x113   :  { %v2993_v1 = vpop.f32.mrf.mxu1  ;;  %1161 = vmatpush.msra.mxu3 %v657_v55 }
 0x114   :  { %v728_v12 = vperm.slane %v2993_v1, 0  ;;  %v714_v15 = vrot.slane %v2993_v1, 1  ;;  %v715_v22 = vrot.slane %v2993_v1, 2  ;;  %v716_v31 = vrot.slane %v2993_v1, 3  ;;  %2072 = vmatpush.msra.mxu2 %v1969_v58  ;;  %v1960_v58 = vld [vmem:[#allocation8 + $0x20] sm:$0xff] }
 0x115   :  { %v212_v59 = vpop.permute.xlu1 %211  ;;  %v96_v60 = vpop.permute.xlu2 %95  ;;  %v717_v35 = vrot.slane %v2993_v1, 4  ;;  %v718_v39 = vrot.slane %v2993_v1, 5  ;;  %v719_v44 = vrot.slane %v2993_v1, 6  ;;  %v720_v48 = vrot.slane %v2993_v1, 7  ;;  %1162 = vmatpush.msra.mxu3 %v656_v56 }
 0x116   :  { %vm252_vm12 = vcmp.eq.s32.totalorder %v2907_v43, %v212_v59  ;;  %vm98_vm13 = vcmp.eq.s32.totalorder %v2907_v43, %v96_v60  ;;  %v729_v18 = vperm.slane %v714_v15, 0  ;;  %v730_v25 = vperm.slane %v715_v22, 0  ;;  %v655_v59 = vld [vmem:[#allocation7 + $0x120] sm:$0xff] }
 0x117   :  { %vm396_vm14 = vmor %vm252_vm12, %vm380_vm11  ;;  %v2412_v61 = vsel %vm98_vm13, 1.0, %v2809_v49  ;;  %v731_v32 = vperm.slane %v716_v31, 0  ;;  %v732_v36 = vperm.slane %v717_v35, 0  ;;  %v733_v40 = vperm.slane %v718_v39, 0  ;;  %v1967_v60 = vld [vmem:[#allocation8 + $0x58] sm:$0xff]  ;;  %1163 = vmatpush.msra.mxu3 %v655_v59 }
 0x118   :  { %v2426_v62 = vsel %vm396_vm14, 1.0, %v2809_v49  ;;  %2432 = vmatmul.msk.f32.gmra.mxu3 %vm433_vm2, %v2412_v61  ;;  %v734_v45 = vperm.slane %v719_v44, 0  ;;  %v735_v50 = vperm.slane %v720_v48, 0  ;;  %2073 = vmatpush.msra.mxu2 %v1967_v60  ;;  %v643_v35 = vld [vmem:[#allocation7 + $0xc0] sm:$0xff]  ;;  %v1985_v44 = vld [vmem:[#allocation8 + $0xe8] sm:$0xff]  ;;  %vm1370_vm13 = vcmask 1041409  }
 0x119   :  { %2446 = vmatmul.msk.f32.gmra.mxu2 %vm433_vm2, %v2426_v62  ;;  %v654_v62 = vld [vmem:[#allocation7 + $0x118] sm:$0xff]  ;;  %v1987_v39 = vld [vmem:[#allocation8 + $0xf8] sm:$0xff]  ;;  %v1977_v60 = vld [vmem:[#allocation8 + $0xa8] sm:$0xff]  ;;  %vm1372_vm14 = vcmask 1042434  }
 0x11a   :  { %1164 = vmatpush.msra.mxu3 %v654_v62  ;;  %2074 = vmatpush.msra.mxu2 %v1965_v6  ;;  %v1983_v48 = vld [vmem:[#allocation8 + $0xd8] sm:$0xff] }
 0x11b   :  { %2019 = vmatpush.msrb.mxu0 %v1987_v39  ;;  %v1975_v6 = vld [vmem:[#allocation8 + $0x98] sm:$0xff] }
 0x11c   :  { %1165 = vmatpush.msra.mxu3 %v653_v3 }
 0x11d   :  { %2020 = vmatpush.msrb.mxu0 %v1985_v44 }
 0x11e   :  { %1166 = vmatpush.msra.mxu3 %v652_v5 }
 0x11f   :  { %2021 = vmatpush.msrb.mxu0 %v1983_v48 }
 0x120   :  { %2453 = vmatmul.msk.f32.vlgmr.msrb.gmra.mxu3 %vm777_vm15, %v2993_v1 }
 0x121   :  { %1167 = vmatpush.msra.mxu3 %v651_v8 }
 0x125   :  { %v347_v9 = vpop.permute.xlu1 %346 }
 0x126   :  { %vm381_vm1 = vcmp.eq.s32.totalorder %v2907_v43, %v347_v9  ;;  %v1963_v9 = vld [vmem:[#allocation8 + $0x38] sm:$0xff] }
 0x127   :  { %vm397_vm3 = vmor %vm253_vm0, %vm381_vm1  ;;  %2075 = vmatpush.msra.mxu2 %v1963_v9  ;;  %vm1374_vm0 = vcmask 1043459   ;;  %vm1376_vm1 = vcmask 1044484  }
 0x128   :  { %v2427_v11 = vsel %vm397_vm3, 1.0, %v2809_v49  ;;  %vm1378_vm3 = vcmask 1045509  }
 0x129   :  { %2447 = vmatmul.msk.f32.gmra.mxu2 %vm433_vm2, %v2427_v11 }
 0x12b   :  { %v3002_v13 = vpop.f32.mrf.mxu2 }
 0x12c   :  { %2471 = vmatmul.msk.f32.vlgmr.msrb.gmra.mxu1 %vm777_vm15, %v3002_v13  ;;  %v760_v14 = vmul.f32 %v728_v12, %v3002_v13  ;;  %v650_v12 = vld [vmem:[#allocation7 + $0xf8] sm:$0xff] }
 0x12d   :  { %v354_v16 = vpop.permute.xlu1 %353  ;;  %1168 = vmatpush.msra.mxu3 %v650_v12  ;;  %v1973_v12 = vld [vmem:[#allocation8 + $0x88] sm:$0xff] }
 0x12e   :  { %vm382_vm5 = vcmp.eq.s32.totalorder %v2907_v43, %v354_v16  ;;  %2455 = vmatmul.msk.f32.vlgmr.msra.gmra.mxu0 %vm777_vm15, %v760_v14  ;;  %v1961_v14 = vld [vmem:[#allocation8 + $0x28] sm:$0xff] }
 0x12f   :  { %vm398_vm6 = vmor %vm254_vm4, %vm382_vm5  ;;  %2076 = vmatpush.msra.mxu2 %v1961_v14  ;;  %v649_v16 = vld [vmem:[#allocation7 + $0xf0] sm:$0xff]  ;;  %vm1380_vm4 = vcmask 1046534   ;;  %vm1382_vm5 = vcmask 1047559  }
 0x130   :  { %v2428_v17 = vsel %vm398_vm6, 1.0, %v2809_v49  ;;  %1169 = vmatpush.msra.mxu3 %v649_v16  ;;  %vm1395_vm6 = vcmask 64512  }
 0x131   :  { %2448 = vmatmul.msk.f32.gmra.mxu2 %vm433_vm2, %v2428_v17  ;;  %v1959_v17 = vld [vmem:[#allocation8 + $0x18] sm:$0xff] }
 0x132   :  { %2077 = vmatpush.msra.mxu2 %v1959_v17 }
 0x133   :  { %v3014_v20 = vpop.f32.mrf.mxu2 }
 0x134   :  { %2472 = vmatmul.msk.f32.gmra.mxu1 %vm777_vm15, %v3014_v20  ;;  %v761_v21 = vmul.f32 %v729_v18, %v3014_v20  ;;  %v648_v18 = vld [vmem:[#allocation7 + $0xe8] sm:$0xff]  ;;  %2078 = vmatpush.msra.mxu2 %v1957_v19 }
 0x135   :  { %v361_v23 = vpop.permute.xlu1 %360  ;;  %1170 = vmatpush.msra.mxu3 %v648_v18 }
 0x136   :  { %vm383_vm8 = vcmp.eq.s32.totalorder %v2907_v43, %v361_v23  ;;  %2456 = vmatmul.msk.f32.gmra.mxu0 %vm777_vm15, %v761_v21 }
 0x137   :  { %vm399_vm9 = vmor %vm255_vm7, %vm383_vm8 }
 0x138   :  { %v2429_v24 = vsel %vm399_vm9, 1.0, %v2809_v49 }
 0x139   :  { %2449 = vmatmul.msk.f32.gmra.mxu2 %vm433_vm2, %v2429_v24  ;;  %v647_v24 = vld [vmem:[#allocation7 + $0xe0] sm:$0xff] }
 0x13a   :  { %1171 = vmatpush.msra.mxu3 %v647_v24 }
 0x13b   :  { %v3025_v27 = vpop.f32.mrf.mxu2 }
 0x13c   :  { %2473 = vmatmul.msk.f32.gmra.mxu1 %vm777_vm15, %v3025_v27  ;;  %v762_v28 = vmul.f32 %v730_v25, %v3025_v27  ;;  %1172 = vmatpush.msra.mxu3 %v646_v26 }
 0x13d   :  { %v368_v29 = vpop.permute.xlu1 %367 }
 0x13e   :  { %vm384_vm11 = vcmp.eq.s32.totalorder %v2907_v43, %v368_v29  ;;  %2457 = vmatmul.msk.f32.gmra.mxu0 %vm777_vm15, %v762_v28  ;;  %v645_v29 = vld [vmem:[#allocation7 + $0xd0] sm:$0xff] }
 0x13f   :  { %vm400_vm12 = vmor %vm256_vm10, %vm384_vm11  ;;  %1173 = vmatpush.msra.mxu3 %v645_v29 }
 0x140   :  { %v2430_v30 = vsel %vm400_vm12, 1.0, %v2809_v49 }
 0x141   :  { %2450 = vmatmul.msk.f32.gmra.mxu2 %vm433_vm2, %v2430_v30  ;;  %v644_v30 = vld [vmem:[#allocation7 + $0xc8] sm:$0xff] }
 0x142   :  { %1174 = vmatpush.msra.mxu3 %v644_v30 }
 0x144   :  { %1175 = vmatpush.msra.mxu3 %v643_v35 }
 0x149   :  { %2487 = vmatmul.msk.f32.vlgmr.msrb.gmra.mxu2 %vm777_vm15, %v2993_v1 }
 0x14b   :  { %v3038_v33 = vpop.f32.mrf.mxu2 }
 0x14c   :  { %2474 = vmatmul.msk.f32.gmra.mxu1 %vm777_vm15, %v3038_v33  ;;  %v763_v34 = vmul.f32 %v731_v32, %v3038_v33 }
 0x14e   :  { %2458 = vmatmul.msk.f32.gmra.mxu0 %vm777_vm15, %v763_v34 }
 0x153   :  { %v3045_v37 = vpop.f32.mrf.mxu2 }
 0x154   :  { %2475 = vmatmul.msk.f32.gmra.mxu1 %vm777_vm15, %v3045_v37  ;;  %v764_v38 = vmul.f32 %v732_v36, %v3045_v37 }
 0x156   :  { %2459 = vmatmul.msk.f32.gmra.mxu0 %vm777_vm15, %v764_v38  ;;  %v1970_v38 = vld [vmem:[#allocation8 + $0x70] sm:$0xff] }
 0x157   :  { %2048 = vmatpush.msra.mxu1 %v1970_v38 }
 0x15b   :  { %v3052_v41 = vpop.f32.mrf.mxu2 }
 0x15c   :  { %2476 = vmatmul.msk.f32.gmra.mxu1 %vm777_vm15, %v3052_v41  ;;  %v765_v42 = vmul.f32 %v733_v40, %v3052_v41  ;;  %v1968_v40 = vld [vmem:[#allocation8 + $0x60] sm:$0xff] }
 0x15d   :  { %2049 = vmatpush.msra.mxu1 %v1968_v40 }
 0x15e   :  { %2460 = vmatmul.msk.f32.gmra.mxu0 %vm777_vm15, %v765_v42  ;;  %v3114_v42 = vld [vmem:[#allocation7 + $0x2c0] ss:$0 sm:$0xff] }
 0x163   :  { %v3059_v46 = vpop.f32.mrf.mxu2 }
 0x164   :  { %2477 = vmatmul.msk.f32.gmra.mxu1 %vm777_vm15, %v3059_v46  ;;  %v766_v47 = vmul.f32 %v734_v45, %v3059_v46  ;;  %v1966_v45 = vld [vmem:[#allocation8 + $0x50] sm:$0xff] }
 0x165   :  { %2050 = vmatpush.msra.mxu1 %v1966_v45 }
 0x166   :  { %2461 = vmatmul.msk.f32.gmra.mxu0 %vm777_vm15, %v766_v47 }
 0x16b   :  { %v3066_v51 = vpop.f32.mrf.mxu2 }
 0x16c   :  { %2478 = vmatmul.msk.f32.gmra.mxu1 %vm777_vm15, %v3066_v51  ;;  %v767_v52 = vmul.f32 %v735_v50, %v3066_v51  ;;  %v1964_v50 = vld [vmem:[#allocation8 + $0x40] sm:$0xff] }
 0x16d   :  { %2051 = vmatpush.msra.mxu1 %v1964_v50 }
 0x16e   :  { %v3071_v53 = vpop.f32.mrf.mxu1  ;;  %2462 = vmatmul.msk.f32.gmra.mxu0 %vm777_vm15, %v767_v52  ;;  %v1981_v52 = vld [vmem:[#allocation8 + $0xc8] sm:$0xff] }
 0x16f   :  { %2454 = vmatmul.msk.f32.gmra.mxu3 %vm777_vm15, %v3071_v53  ;;  %2488 = vmatmul.msk.f32.gmra.mxu2 %vm777_vm15, %v3071_v53  ;;  %v736_v61 = vperm.slane %v3071_v53, 0  ;;  %v721_v4 = vrot.slane %v3071_v53, 1  ;;  %v722_v15 = vrot.slane %v3071_v53, 2  ;;  %v723_v28 = vrot.slane %v3071_v53, 3 }
 0x170   :  { %v724_v56 = vrot.slane %v3071_v53, 4  ;;  %2022 = vmatpush.msrb.mxu0 %v1981_v52  ;;  %2052 = vmatpush.msra.mxu1 %v1962_v54  ;;  %v725_v14 = vrot.slane %v3071_v53, 5  ;;  %v726_v29 = vrot.slane %v3071_v53, 6  ;;  %v727_v52 = vrot.slane %v3071_v53, 7 }
 0x171   :  { %v737_v7 = vperm.slane %v721_v4, 0  ;;  %v738_v21 = vperm.slane %v722_v15, 0  ;;  %v739_v31 = vperm.slane %v723_v28, 0 }
 0x172   :  { %2023 = vmatpush.msrb.mxu0 %v1979_v57  ;;  %2053 = vmatpush.msra.mxu1 %v1960_v58  ;;  %v740_v3 = vperm.slane %v724_v56, 0  ;;  %v741_v19 = vperm.slane %v725_v14, 0  ;;  %v742_v44 = vperm.slane %v726_v29, 0 }
 0x174   :  { %2024 = vmatpush.msrb.mxu0 %v1977_v60 }
 0x176   :  { %2025 = vmatpush.msrb.mxu0 %v1975_v6 }
 0x178   :  { %2026 = vmatpush.msrb.mxu0 %v1973_v12 }
 0x184   :  { %v3079_v63 = vpop.f32.mrf.mxu2 }
 0x185   :  { %2479 = vmatmul.msk.f32.gmra.mxu1 %vm777_vm15, %v3079_v63  ;;  %v768_v0 = vmul.f32 %v736_v61, %v3079_v63  ;;  %v1958_v61 = vld [vmem:[#allocation8 + $0x10] sm:$0xff] }
 0x186   :  { %2054 = vmatpush.msra.mxu1 %v1958_v61 }
 0x187   :  { %2463 = vmatmul.msk.f32.gmra.mxu0 %vm777_vm15, %v768_v0 }
 0x18c   :  { %v3086_v10 = vpop.f32.mrf.mxu2 }
 0x18d   :  { %2480 = vmatmul.msk.f32.gmra.mxu1 %vm777_vm15, %v3086_v10  ;;  %v769_v11 = vmul.f32 %v737_v7, %v3086_v10  ;;  %v1956_v7 = vld [vmem:[#allocation8] sm:$0xff] }
 0x18e   :  { %2055 = vmatpush.msra.mxu1 %v1956_v7 }
 0x18f   :  { %2464 = vmatmul.msk.f32.gmra.mxu0 %vm777_vm15, %v769_v11 }
 0x193   :  { %v3093_v22 = vpop.f32.mrf.mxu3 }
 0x194   :  { %v3095_v23 = vpop.f32.mrf.mxu2  ;;  %2493 = vmatmul.msk.f32.vlgmr.msra.gmra.mxu2 %vm777_vm15, %v3093_v22 }
 0x195   :  { %2481 = vmatmul.msk.f32.gmra.mxu1 %vm777_vm15, %v3095_v23  ;;  %v770_v25 = vmul.f32 %v738_v21, %v3095_v23 }
 0x197   :  { %2465 = vmatmul.msk.f32.gmra.mxu0 %vm777_vm15, %v770_v25 }
 0x19b   :  { %v3104_v32 = vpop.f32.mrf.mxu3 }
 0x19c   :  { %v3106_v34 = vpop.f32.mrf.mxu2  ;;  %2494 = vmatmul.msk.f32.gmra.mxu2 %vm777_vm15, %v3104_v32 }
 0x19d   :  { %2482 = vmatmul.msk.f32.gmra.mxu1 %vm777_vm15, %v3106_v34  ;;  %v771_v36 = vmul.f32 %v739_v31, %v3106_v34 }
 0x19f   :  { %2466 = vmatmul.msk.f32.gmra.mxu0 %vm777_vm15, %v771_v36 }
 0x1a3   :  { %v799_v47 = vpop.f32.mrf.mxu3 }
 0x1a4   :  { %v3117_v55 = vadd.f32 %v3114_v42, %v799_v47 }
 0x1a6   :  { %v1047_v62 = vperm.slane %v3117_v55, 0  ;;  %v1033_v11 = vrot.slane %v3117_v55, 1  ;;  %v1034_v28 = vrot.slane %v3117_v55, 2  ;;  %v1036_v14 = vrot.slane %v3117_v55, 4 }
 0x1a8   :  { %v1048_v17 = vperm.slane %v1033_v11, 0  ;;  %v1049_v36 = vperm.slane %v1034_v28, 0 }
 0x1a9   :  { %v983_v59 = vpop.f32.mrf.mxu1 }
 0x1ab   :  { %v870_v0 = vpop.f32.mrf.mxu0 }
 0x1ac   :  { %v984_v4 = vadd.f32 %v983_v59, %v870_v0  ;;  %v3121_v5 = vpop.f32.mrf.mxu2  ;;  %v743_v59 = vperm.slane %v727_v52, 0  ;;  %v1035_v0 = vrot.slane %v3117_v55, 3 }
 0x1ad   :  { %2483 = vmatmul.msk.f32.gmra.mxu1 %vm777_vm15, %v3121_v5  ;;  %v772_v8 = vmul.f32 %v740_v3, %v3121_v5 }
 0x1ae   :  { %v1079_v9 = vadd.f32 %v1047_v62, %v984_v4 }
 0x1af   :  { %2467 = vmatmul.msk.f32.gmra.mxu0 %vm777_vm15, %v772_v8 }
 0x1b0   :  { %v1095_v15 = vmul.f32 0.5, %v1079_v9  ;;  %v1050_v9 = vperm.slane %v1035_v0, 0 }
 0x1b1   :  { %v986_v16 = vpop.f32.mrf.mxu1 }
 0x1b2   :  { %2593 = vtanh.f32 %v1095_v15 }
 0x1b3   :  { %v873_v18 = vpop.f32.mrf.mxu0 }
 0x1b4   :  { %v987_v21 = vadd.f32 %v986_v16, %v873_v18  ;;  %v3129_v24 = vpop.f32.mrf.mxu2  ;;  %v1051_v18 = vperm.slane %v1036_v14, 0 }
 0x1b5   :  { %2484 = vmatmul.msk.f32.gmra.mxu1 %vm777_vm15, %v3129_v24  ;;  %v773_v25 = vmul.f32 %v741_v19, %v3129_v24 }
 0x1b6   :  { %v1080_v26 = vadd.f32 %v1048_v17, %v987_v21 }
 0x1b7   :  { %2468 = vmatmul.msk.f32.gmra.mxu0 %vm777_vm15, %v773_v25  ;;  %v1037_v25 = vrot.slane %v3117_v55, 5 }
 0x1b8   :  { %v2594_v30 = vpop.eup %2593  ;;  %v1096_v31 = vmul.f32 0.5, %v1080_v26 }
 0x1b9   :  { %v1127_v35 = vadd.f32 1.0, %v2594_v30  ;;  %v989_v39 = vpop.f32.mrf.mxu1 }
 0x1ba   :  { %2595 = vtanh.f32 %v1096_v31  ;;  %v1052_v31 = vperm.slane %v1037_v25, 0 }
 0x1bb   :  { %v1143_v38 = vmul.f32 0.5, %v1127_v35  ;;  %v876_v40 = vpop.f32.mrf.mxu0 }
 0x1bc   :  { %v990_v45 = vadd.f32 %v989_v39, %v876_v40  ;;  %v3137_v47 = vpop.f32.mrf.mxu2 }
 0x1bd   :  { %2485 = vmatmul.msk.f32.gmra.mxu1 %vm777_vm15, %v3137_v47  ;;  %1176 = vmatmul.f32.vlgmr.msra.gmra.mxu3 %v1143_v38  ;;  %v774_v48 = vmul.f32 %v742_v44, %v3137_v47 }
 0x1be   :  { %v1081_v50 = vadd.f32 %v1049_v36, %v990_v45 }
 0x1bf   :  { %2469 = vmatmul.msk.f32.gmra.mxu0 %vm777_vm15, %v774_v48 }
 0x1c0   :  { %v2596_v54 = vpop.eup %2595  ;;  %v1097_v56 = vmul.f32 0.5, %v1081_v50 }
 0x1c1   :  { %v1128_v57 = vadd.f32 1.0, %v2596_v54 }
 0x1c2   :  { %2597 = vtanh.f32 %v1097_v56  ;;  %v1039_v56 = vrot.slane %v3117_v55, 7 }
 0x1c3   :  { %v1144_v58 = vmul.f32 0.5, %v1128_v57 }
 0x1c4   :  { %v3144_v60 = vpop.f32.mrf.mxu2  ;;  %v1054_v0 = vperm.slane %v1039_v56, 0 }
 0x1c5   :  { %2486 = vmatmul.msk.f32.gmra.mxu1 %vm777_vm15, %v3144_v60  ;;  %1179 = vmatmul.f32.gmra.mxu3 %v1144_v58  ;;  %v775_v61 = vmul.f32 %v743_v59, %v3144_v60 }
 0x1c7   :  { %2470 = vmatmul.msk.f32.gmra.mxu0 %vm777_vm15, %v775_v61 }
 0x1c8   :  { %v2598_v62 = vpop.eup %2597 }
 0x1c9   :  { %v992_v3 = vpop.f32.mrf.mxu1  ;;  %v1129_v4 = vadd.f32 1.0, %v2598_v62 }
 0x1cb   :  { %v879_v6 = vpop.f32.mrf.mxu0  ;;  %v1145_v7 = vmul.f32 0.5, %v1129_v4 }
 0x1cc   :  { %v993_v8 = vadd.f32 %v992_v3, %v879_v6 }
 0x1cd   :  { %1182 = vmatmul.f32.gmra.mxu3 %v1145_v7  ;;  %2491 = vmatmul.msk.f32.vlgmr.msra.gmra.mxu1 %vm777_vm15, %v3093_v22 }
 0x1ce   :  { %v1082_v11 = vadd.f32 %v1050_v9, %v993_v8 }
 0x1cf   :  { %2489 = vmatmul.msk.f32.vlgmr.msrb.gmra.mxu0 %vm777_vm15, %v2993_v1 }
 0x1d0   :  { %v1098_v12 = vmul.f32 0.5, %v1082_v11 }
 0x1d1   :  { %v995_v15 = vpop.f32.mrf.mxu1 }
 0x1d2   :  { %2599 = vtanh.f32 %v1098_v12 }
 0x1d3   :  { %v882_v16 = vpop.f32.mrf.mxu0 }
 0x1d4   :  { %v996_v17 = vadd.f32 %v995_v15, %v882_v16 }
 0x1d5   :  { %2492 = vmatmul.msk.f32.gmra.mxu1 %vm777_vm15, %v3104_v32  ;;  %v1038_v32 = vrot.slane %v3117_v55, 6 }
 0x1d6   :  { %v1083_v19 = vadd.f32 %v1051_v18, %v996_v17 }
 0x1d7   :  { %2490 = vmatmul.msk.f32.gmra.mxu0 %vm777_vm15, %v3071_v53  ;;  %v1053_v48 = vperm.slane %v1038_v32, 0 }
 0x1d8   :  { %v2600_v22 = vpop.eup %2599  ;;  %v1099_v21 = vmul.f32 0.5, %v1083_v19 }
 0x1d9   :  { %v998_v1 = vpop.f32.mrf.mxu1  ;;  %v1130_v26 = vadd.f32 1.0, %v2600_v22  ;;  %v2811_v22 = vmov 19  }
 0x1da   :  { %2601 = vtanh.f32 %v1099_v21  ;;  %2541 = vset.pattern.permute.xlu2 %v2811_v22  ;;  %v3168_v21 = vld [vmem:[#allocation2] sm:$0xff] }
 0x1db   :  { %v885_v28 = vpop.f32.mrf.mxu0  ;;  %v1146_v29 = vmul.f32 0.5, %v1130_v26  ;;  %606 = vperm.xlu2 %2541, %v3168_v21  }
 0x1dc   :  { %v999_v30 = vadd.f32 %v998_v1, %v885_v28 }
 0x1dd   :  { %1185 = vmatmul.f32.gmra.mxu3 %v1146_v29 }
 0x1de   :  { %v1084_v35 = vadd.f32 %v1052_v31, %v999_v30 }
 0x1e0   :  { %v2602_v36 = vpop.eup %2601  ;;  %v1100_v38 = vmul.f32 0.5, %v1084_v35 }
 0x1e1   :  { %v1001_v39 = vpop.f32.mrf.mxu1  ;;  %v1131_v40 = vadd.f32 1.0, %v2602_v36 }
 0x1e2   :  { %2603 = vtanh.f32 %v1100_v38 }
 0x1e3   :  { %v888_v53 = vpop.f32.mrf.mxu0  ;;  %v1147_v44 = vmul.f32 0.5, %v1131_v40 }
 0x1e4   :  { %v1002_v45 = vadd.f32 %v1001_v39, %v888_v53 }
 0x1e5   :  { %1188 = vmatmul.f32.gmra.mxu3 %v1147_v44 }
 0x1e6   :  { %v1085_v50 = vadd.f32 %v1053_v48, %v1002_v45 }
 0x1e8   :  { %v2604_v52 = vpop.eup %2603  ;;  %v1101_v54 = vmul.f32 0.5, %v1085_v50 }
 0x1e9   :  { %v1132_v57 = vadd.f32 1.0, %v2604_v52  ;;  %v1004_v58 = vpop.f32.mrf.mxu1 }
 0x1ea   :  { %2605 = vtanh.f32 %v1101_v54 }
 0x1eb   :  { %v891_v59 = vpop.f32.mrf.mxu0  ;;  %v1148_v61 = vmul.f32 0.5, %v1132_v57 }
 0x1ec   :  { %v1005_v62 = vadd.f32 %v1004_v58, %v891_v59 }
 0x1ed   :  { %1191 = vmatmul.f32.gmra.mxu3 %v1148_v61 }
 0x1ee   :  { %v1086_v3 = vadd.f32 %v1054_v0, %v1005_v62 }
 0x1f0   :  { %v2606_v4 = vpop.eup %2605  ;;  %v1102_v6 = vmul.f32 0.5, %v1086_v3 }
 0x1f1   :  { %v1133_v7 = vadd.f32 1.0, %v2606_v4 }
 0x1f2   :  { %2607 = vtanh.f32 %v1102_v6  ;;  %v802_v55 = vpop.f32.mrf.mxu3 }
 0x1f3   :  { %v1149_v8 = vmul.f32 0.5, %v1133_v7  ;;  %v3164_v14 = vadd.f32 %v3114_v42, %v802_v55 }
 0x1f5   :  { %1194 = vmatmul.f32.gmra.mxu3 %v1149_v8  ;;  %v1055_v18 = vperm.slane %v3164_v14, 0  ;;  %v1040_v1 = vrot.slane %v3164_v14, 1  ;;  %v1041_v36 = vrot.slane %v3164_v14, 2  ;;  %v1042_v52 = vrot.slane %v3164_v14, 3 }
 0x1f6   :  { %v1043_v8 = vrot.slane %v3164_v14, 4 }
 0x1f7   :  { %v1056_v29 = vperm.slane %v1040_v1, 0  ;;  %v1057_v44 = vperm.slane %v1041_v36, 0  ;;  %v1058_v61 = vperm.slane %v1042_v52, 0 }
 0x1f8   :  { %v2608_v9 = vpop.eup %2607 }
 0x1f9   :  { %v1134_v11 = vadd.f32 1.0, %v2608_v9 }
 0x1fb   :  { %v1150_v12 = vmul.f32 0.5, %v1134_v11 }
 0x1fd   :  { %1197 = vmatmul.f32.gmra.mxu3 %v1150_v12 }
 0x202   :  { %v1007_v15 = vpop.f32.mrf.mxu1 }
 0x204   :  { %v894_v16 = vpop.f32.mrf.mxu0 }
 0x205   :  { %v1008_v17 = vadd.f32 %v1007_v15, %v894_v16  ;;  %v1059_v16 = vperm.slane %v1043_v8, 0 }
 0x207   :  { %v1087_v19 = vadd.f32 %v1055_v18, %v1008_v17 }
 0x209   :  { %v1103_v25 = vmul.f32 0.5, %v1087_v19  ;;  %v1044_v19 = vrot.slane %v3164_v14, 5 }
 0x20a   :  { %v1010_v26 = vpop.f32.mrf.mxu1 }
 0x20b   :  { %2609 = vtanh.f32 %v1103_v25 }
 0x20c   :  { %v897_v42 = vpop.f32.mrf.mxu0 }
 0x20d   :  { %v1011_v28 = vadd.f32 %v1010_v26, %v897_v42  ;;  %v1060_v42 = vperm.slane %v1044_v19, 0 }
 0x20f   :  { %v1088_v30 = vadd.f32 %v1056_v29, %v1011_v28 }
 0x211   :  { %v2610_v31 = vpop.eup %2609  ;;  %v1104_v35 = vmul.f32 0.5, %v1088_v30 }
 0x212   :  { %v1013_v38 = vpop.f32.mrf.mxu1  ;;  %v1135_v32 = vadd.f32 1.0, %v2610_v31  ;;  %v1045_v31 = vrot.slane %v3164_v14, 6 }
 0x213   :  { %2611 = vtanh.f32 %v1104_v35 }
 0x214   :  { %v900_v39 = vpop.f32.mrf.mxu0  ;;  %v1151_v40 = vmul.f32 0.5, %v1135_v32 }
 0x215   :  { %v1014_v53 = vadd.f32 %v1013_v38, %v900_v39 }
 0x216   :  { %1200 = vmatmul.f32.gmra.mxu3 %v1151_v40  ;;  %v1061_v40 = vperm.slane %v1045_v31, 0 }
 0x217   :  { %v1089_v45 = vadd.f32 %v1057_v44, %v1014_v53  ;;  %v3177_v53 = vld [vmem:[#allocation7 + $0x2c1] ss:$0 sm:$0xff] }
 0x219   :  { %v2612_v48 = vpop.eup %2611  ;;  %v1105_v50 = vmul.f32 0.5, %v1089_v45 }
 0x21a   :  { %v1136_v54 = vadd.f32 1.0, %v2612_v48  ;;  %v1016_v56 = vpop.f32.mrf.mxu1 }
 0x21b   :  { %2613 = vtanh.f32 %v1105_v50 }
 0x21c   :  { %v903_v57 = vpop.f32.mrf.mxu0  ;;  %v1152_v58 = vmul.f32 0.5, %v1136_v54  ;;  %v1046_v54 = vrot.slane %v3164_v14, 7 }
 0x21d   :  { %v1017_v59 = vadd.f32 %v1016_v56, %v903_v57 }
 0x21e   :  { %1203 = vmatmul.f32.gmra.mxu3 %v1152_v58 }
 0x21f   :  { %v1090_v62 = vadd.f32 %v1058_v61, %v1017_v59 }
 0x221   :  { %v2614_v0 = vpop.eup %2613  ;;  %v1106_v3 = vmul.f32 0.5, %v1090_v62 }
 0x222   :  { %v1137_v4 = vadd.f32 1.0, %v2614_v0  ;;  %v1062_v0 = vperm.slane %v1046_v54, 0 }
 0x223   :  { %2615 = vtanh.f32 %v1106_v3 }
 0x224   :  { %v1153_v6 = vmul.f32 0.5, %v1137_v4 }
 0x226   :  { %1206 = vmatmul.f32.gmra.mxu3 %v1153_v6 }
 0x229   :  { %v2616_v7 = vpop.eup %2615 }
 0x22a   :  { %v1019_v9 = vpop.f32.mrf.mxu1  ;;  %v1138_v11 = vadd.f32 1.0, %v2616_v7 }
 0x22c   :  { %v906_v12 = vpop.f32.mrf.mxu0  ;;  %v1154_v55 = vmul.f32 0.5, %v1138_v11 }
 0x22d   :  { %v1020_v15 = vadd.f32 %v1019_v9, %v906_v12 }
 0x22e   :  { %1209 = vmatmul.f32.gmra.mxu3 %v1154_v55 }
 0x22f   :  { %v1091_v17 = vadd.f32 %v1059_v16, %v1020_v15  ;;  %v3182_v15 = vld [vmem:[#allocation7 + $0x2c2] ss:$0 sm:$0xff] }
 0x231   :  { %v1107_v18 = vmul.f32 0.5, %v1091_v17 }
 0x232   :  { %v1022_v25 = vpop.f32.mrf.mxu1 }
 0x233   :  { %2617 = vtanh.f32 %v1107_v18 }
 0x234   :  { %v909_v1 = vpop.f32.mrf.mxu0 }
 0x235   :  { %v1023_v26 = vadd.f32 %v1022_v25, %v909_v1 }
 0x237   :  { %v1092_v28 = vadd.f32 %v1060_v42, %v1023_v26 }
 0x239   :  { %v2618_v29 = vpop.eup %2617  ;;  %v1108_v30 = vmul.f32 0.5, %v1092_v28 }
 0x23a   :  { %v1025_v35 = vpop.f32.mrf.mxu1  ;;  %v1139_v36 = vadd.f32 1.0, %v2618_v29 }
 0x23b   :  { %2619 = vtanh.f32 %v1108_v30 }
 0x23c   :  { %v912_v38 = vpop.f32.mrf.mxu0  ;;  %v1155_v32 = vmul.f32 0.5, %v1139_v36 }
 0x23d   :  { %v1026_v39 = vadd.f32 %v1025_v35, %v912_v38 }
 0x23e   :  { %1212 = vmatmul.f32.gmra.mxu3 %v1155_v32 }
 0x23f   :  { %v1093_v44 = vadd.f32 %v1061_v40, %v1026_v39 }
 0x240   :  { %v1177_v45 = vpop.f32.mrf.mxu3 }
 0x241   :  { %v2620_v48 = vpop.eup %2619  ;;  %v1109_v50 = vmul.f32 0.5, %v1093_v44  ;;  %v1178_v52 = vadd.f32 %v3177_v53, %v1177_v45 }
 0x242   :  { %v1140_v56 = vadd.f32 1.0, %v2620_v48  ;;  %v1028_v58 = vpop.f32.mrf.mxu1 }
 0x243   :  { %2621 = vtanh.f32 %v1109_v50  ;;  %v1225_v57 = vmul.f32 0.5, %v1178_v52 }
 0x244   :  { %v915_v59 = vpop.f32.mrf.mxu0  ;;  %v1156_v61 = vmul.f32 0.5, %v1140_v56 }
 0x245   :  { %2623 = vtanh.f32 %v1225_v57  ;;  %v1029_v62 = vadd.f32 %v1028_v58, %v915_v59 }
 0x246   :  { %1215 = vmatmul.f32.gmra.mxu3 %v1156_v61 }
 0x247   :  { %v1094_v3 = vadd.f32 %v1062_v0, %v1029_v62 }
 0x248   :  { %v1180_v4 = vpop.f32.mrf.mxu3 }
 0x249   :  { %v2622_v6 = vpop.eup %2621  ;;  %v1110_v7 = vmul.f32 0.5, %v1094_v3  ;;  %v1181_v8 = vadd.f32 %v3177_v53, %v1180_v4 }
 0x24a   :  { %v1141_v9 = vadd.f32 1.0, %v2622_v6 }
 0x24b   :  { %v2624_v11 = vpop.eup %2623  ;;  %2625 = vtanh.f32 %v1110_v7  ;;  %v1226_v14 = vmul.f32 0.5, %v1181_v8 }
 0x24c   :  { %v1257_v12 = vadd.f32 1.0, %v2624_v11  ;;  %v1157_v55 = vmul.f32 0.5, %v1141_v9 }
 0x24d   :  { %2627 = vtanh.f32 %v1226_v14 }
 0x24e   :  { %1218 = vmatmul.f32.gmra.mxu3 %v1157_v55  ;;  %v1273_v16 = vmul.f32 0.5, %v1257_v12 }
 0x250   :  { %v1183_v17 = vpop.f32.mrf.mxu3  ;;  %v1290_v18 = vmul.f32 %v3182_v15, %v1273_v16 }
 0x251   :  { %v2626_v19 = vpop.eup %2625  ;;  %v1184_v25 = vadd.f32 %v3177_v53, %v1183_v17 }
 0x252   :  { %1306 = vadd.xlane.f32.xlu2 %v1290_v18  ;;  %v1142_v1 = vadd.f32 1.0, %v2626_v19 }
 0x253   :  { %v2628_v26 = vpop.eup %2627  ;;  %v1227_v42 = vmul.f32 0.5, %v1184_v25 }
 0x254   :  { %v1258_v28 = vadd.f32 1.0, %v2628_v26  ;;  %v1158_v29 = vmul.f32 0.5, %v1142_v1 }
 0x255   :  { %2629 = vtanh.f32 %v1227_v42 }
 0x256   :  { %1221 = vmatmul.f32.gmra.mxu3 %v1158_v29  ;;  %v1274_v30 = vmul.f32 0.5, %v1258_v28 }
 0x258   :  { %v1291_v31 = vmul.f32 %v3182_v15, %v1274_v30 }
 0x25a   :  { %1308 = vadd.xlane.f32.xlu0 %v1291_v31 }
 0x25b   :  { %v2630_v35 = vpop.eup %2629 }
 0x25c   :  { %v1259_v36 = vadd.f32 1.0, %v2630_v35 }
 0x25e   :  { %v1275_v38 = vmul.f32 0.5, %v1259_v36 }
 0x260   :  { %v1186_v32 = vpop.f32.mrf.mxu3  ;;  %v1292_v39 = vmul.f32 %v3182_v15, %v1275_v38 }
 0x261   :  { %v1187_v40 = vadd.f32 %v3177_v53, %v1186_v32 }
 0x262   :  { %1310 = vadd.xlane.f32.xlu1 %v1292_v39 }
 0x263   :  { %v1228_v44 = vmul.f32 0.5, %v1187_v40 }
 0x265   :  { %2631 = vtanh.f32 %v1228_v44 }
 0x268   :  { %v1189_v45 = vpop.f32.mrf.mxu3 }
 0x269   :  { %v1190_v48 = vadd.f32 %v3177_v53, %v1189_v45 }
 0x26b   :  { %v2632_v50 = vpop.eup %2631  ;;  %v1229_v52 = vmul.f32 0.5, %v1190_v48 }
 0x26c   :  { %v1260_v54 = vadd.f32 1.0, %v2632_v50  ;;  %v3201_v50 = vpop.permute.xlu2 %606 }
 0x26d   :  { %2633 = vtanh.f32 %v1229_v52  ;;  %vm611_vm2 = vcmp.lt.s32.totalorder %v2907_v43, %v3201_v50 }
 0x26e   :  { %v1276_v56 = vmul.f32 0.5, %v1260_v54  ;;  %v3204_v54 = vld [vmem:[#allocation2 + $0x8] sm:$0xff] }
 0x270   :  { %v1192_v57 = vpop.f32.mrf.mxu3  ;;  %v1293_v58 = vmul.f32 %v3182_v15, %v1276_v56 }
 0x271   :  { %v1193_v59 = vadd.f32 %v3177_v53, %v1192_v57 }
 0x272   :  { %1312 = vadd.xlane.f32.xlu2 %v1293_v58 }
 0x273   :  { %v2634_v61 = vpop.eup %2633  ;;  %v1230_v62 = vmul.f32 0.5, %v1193_v59 }
 0x274   :  { %v1261_v0 = vadd.f32 1.0, %v2634_v61  ;;  %v3213_v61 = vsel %vm611_vm2, 1.0, %v2809_v49 }
 0x275   :  { %2635 = vtanh.f32 %v1230_v62 }
 0x276   :  { %v1277_v3 = vmul.f32 0.5, %v1261_v0 }
 0x278   :  { %v1195_v4 = vpop.f32.mrf.mxu3  ;;  %v1294_v6 = vmul.f32 %v3182_v15, %v1277_v3 }
 0x279   :  { %v1196_v7 = vadd.f32 %v3177_v53, %v1195_v4  ;;  %v1420_v4 = vperm.slane %v3213_v61, 0 }
 0x27a   :  { %1314 = vadd.xlane.f32.xlu2 %v1294_v6  ;;  %v1441_v6 = vperm.slane %v3213_v61, 3 }
 0x27b   :  { %v2636_v8 = vpop.eup %2635  ;;  %v1231_v9 = vmul.f32 0.5, %v1196_v7 }
 0x27c   :  { %v1262_v11 = vadd.f32 1.0, %v2636_v8 }
 0x27d   :  { %2637 = vtanh.f32 %v1231_v9 }
 0x27e   :  { %v1278_v14 = vmul.f32 0.5, %v1262_v11  ;;  %v2549_v11 = vpack.i.bf16 %v1441_v6, %v1420_v4 }
 0x280   :  { %v1198_v12 = vpop.f32.mrf.mxu3  ;;  %v1295_v55 = vmul.f32 %v3182_v15, %v1278_v14 }
 0x281   :  { %v1199_v16 = vadd.f32 %v3177_v53, %v1198_v12 }
 0x282   :  { %1316 = vadd.xlane.f32.xlu0 %v1295_v55 }
 0x283   :  { %v2638_v17 = vpop.eup %2637  ;;  %v1232_v18 = vmul.f32 0.5, %v1199_v16 }
 0x284   :  { %v1263_v19 = vadd.f32 1.0, %v2638_v17 }
 0x285   :  { %2639 = vtanh.f32 %v1232_v18 }
 0x286   :  { %v1279_v25 = vmul.f32 0.5, %v1263_v19 }
 0x288   :  { %v1296_v1 = vmul.f32 %v3182_v15, %v1279_v25 }
 0x28a   :  { %1318 = vadd.xlane.f32.xlu1 %v1296_v1 }
 0x28b   :  { %v2640_v26 = vpop.eup %2639 }
 0x28c   :  { %v1264_v42 = vadd.f32 1.0, %v2640_v26 }
 0x28e   :  { %v1280_v28 = vmul.f32 0.5, %v1264_v42 }
 0x290   :  { %v1297_v29 = vmul.f32 %v3182_v15, %v1280_v28 }
 0x292   :  { %1320 = vadd.xlane.f32.xlu2 %v1297_v29 }
 0x299   :  { %v1201_v30 = vpop.f32.mrf.mxu3 }
 0x29a   :  { %v1202_v31 = vadd.f32 %v3177_v53, %v1201_v30 }
 0x29c   :  { %v1233_v35 = vmul.f32 0.5, %v1202_v31 }
 0x29e   :  { %2641 = vtanh.f32 %v1233_v35 }
 0x2a1   :  { %v1204_v36 = vpop.f32.mrf.mxu3 }
 0x2a2   :  { %v1205_v38 = vadd.f32 %v3177_v53, %v1204_v36 }
 0x2a4   :  { %v2642_v32 = vpop.eup %2641  ;;  %v1234_v39 = vmul.f32 0.5, %v1205_v38 }
 0x2a5   :  { %v1265_v40 = vadd.f32 1.0, %v2642_v32 }
 0x2a6   :  { %2643 = vtanh.f32 %v1234_v39 }
 0x2a7   :  { %v1281_v44 = vmul.f32 0.5, %v1265_v40 }
 0x2a9   :  { %v1207_v45 = vpop.f32.mrf.mxu3  ;;  %v1298_v48 = vmul.f32 %v3182_v15, %v1281_v44 }
 0x2aa   :  { %v1208_v52 = vadd.f32 %v3177_v53, %v1207_v45  ;;  %609 = vperm.xlu2 %2541, %v3204_v54  }
 0x2ab   :  { %1322 = vadd.xlane.f32.xlu0 %v1298_v48 }
 0x2ac   :  { %v2644_v56 = vpop.eup %2643  ;;  %v1235_v57 = vmul.f32 0.5, %v1208_v52 }
 0x2ad   :  { %v1266_v58 = vadd.f32 1.0, %v2644_v56 }
 0x2ae   :  { %2645 = vtanh.f32 %v1235_v57 }
 0x2af   :  { %v1282_v59 = vmul.f32 0.5, %v1266_v58 }
 0x2b1   :  { %v1210_v62 = vpop.f32.mrf.mxu3  ;;  %v1299_v0 = vmul.f32 %v3182_v15, %v1282_v59 }
 0x2b2   :  { %v1211_v3 = vadd.f32 %v3177_v53, %v1210_v62  ;;  %2548 = vset.pattern.permute.xlu2 %v2860_v2 }
 0x2b3   :  { %1324 = vadd.xlane.f32.xlu1 %v1299_v0 }
 0x2b4   :  { %v2646_v7 = vpop.eup %2645  ;;  %v1236_v8 = vmul.f32 0.5, %v1211_v3 }
 0x2b5   :  { %v1267_v9 = vadd.f32 1.0, %v2646_v7  ;;  %v1448_v7 = vperm.slane %v3213_v61, 4 }
 0x2b6   :  { %2647 = vtanh.f32 %v1236_v8  ;;  %v1455_v8 = vperm.slane %v3213_v61, 5 }
 0x2b7   :  { %v1283_v14 = vmul.f32 0.5, %v1267_v9 }
 0x2b9   :  { %v1300_v12 = vmul.f32 %v3182_v15, %v1283_v14  ;;  %v1434_v14 = vperm.slane %v3213_v61, 2 }
 0x2ba   :  { %2550 = vperm.xlu2 %2548, %v2549_v11   ;;  %v1427_v11 = vperm.slane %v3213_v61, 1 }
 0x2bb   :  { %1326 = vadd.xlane.f32.xlu0 %v1300_v12 }
 0x2bc   :  { %v2648_v55 = vpop.eup %2647 }
 0x2bd   :  { %v1268_v16 = vadd.f32 1.0, %v2648_v55  ;;  %v2543_v55 = vpack.i.bf16 %v1434_v14, %v1427_v11 }
 0x2bf   :  { %v1284_v17 = vmul.f32 0.5, %v1268_v16 }
 0x2c1   :  { %v1213_v18 = vpop.f32.mrf.mxu3  ;;  %v1301_v19 = vmul.f32 %v3182_v15, %v1284_v17 }
 0x2c2   :  { %v1214_v25 = vadd.f32 %v3177_v53, %v1213_v18 }
 0x2c3   :  { %1328 = vadd.xlane.f32.xlu1 %v1301_v19 }
 0x2c4   :  { %v1237_v1 = vmul.f32 0.5, %v1214_v25 }
 0x2c5   :  { %v1307_v9 = vpop.xlane.xlu2 %1306 }
 0x2c6   :  { %2649 = vtanh.f32 %v1237_v1  ;;  %v1354_v1 = vperm.slane %v1307_v9, %v2907_v43 }
 0x2c9   :  { %v1216_v26 = vpop.f32.mrf.mxu3 }
 0x2ca   :  { %v1217_v42 = vadd.f32 %v3177_v53, %v1216_v26 }
 0x2cc   :  { %v2650_v28 = vpop.eup %2649  ;;  %v1238_v29 = vmul.f32 0.5, %v1217_v42 }
 0x2cd   :  { %v1269_v30 = vadd.f32 1.0, %v2650_v28  ;;  %v1309_v16 = vpop.xlane.xlu0 %1308 }
 0x2ce   :  { %2651 = vtanh.f32 %v1238_v29 }
 0x2cf   :  { %v1285_v31 = vmul.f32 0.5, %v1269_v30 }
 0x2d1   :  { %v1219_v35 = vpop.f32.mrf.mxu3  ;;  %v1302_v36 = vmul.f32 %v3182_v15, %v1285_v31 }
 0x2d2   :  { %v1220_v38 = vadd.f32 %v3177_v53, %v1219_v35 }
 0x2d3   :  { %1330 = vadd.xlane.f32.xlu0 %v1302_v36 }
 0x2d4   :  { %v2652_v32 = vpop.eup %2651  ;;  %v1239_v39 = vmul.f32 0.5, %v1220_v38 }
 0x2d5   :  { %v1270_v40 = vadd.f32 1.0, %v2652_v32  ;;  %v1311_v17 = vpop.xlane.xlu1 %1310 }
 0x2d6   :  { %2653 = vtanh.f32 %v1239_v39  ;;  %v1356_v19 = vperm.slane %v1311_v17, %v2907_v43 }
 0x2d7   :  { %v1286_v44 = vmul.f32 0.5, %v1270_v40 }
 0x2d9   :  { %v1222_v45 = vpop.f32.mrf.mxu3  ;;  %v1303_v48 = vmul.f32 %v3182_v15, %v1286_v44 }
 0x2da   :  { %v1223_v52 = vadd.f32 %v3177_v53, %v1222_v45  ;;  %v2555_v53 = vpack.i.bf16 %v1455_v8, %v1448_v7 }
 0x2db   :  { %1332 = vadd.xlane.f32.xlu1 %v1303_v48 }
 0x2dc   :  { %v2654_v56 = vpop.eup %2653  ;;  %v1240_v57 = vmul.f32 0.5, %v1223_v52 }
 0x2dd   :  { %v1271_v58 = vadd.f32 1.0, %v2654_v56 }
 0x2de   :  { %2655 = vtanh.f32 %v1240_v57 }
 0x2df   :  { %v1287_v59 = vmul.f32 0.5, %v1271_v58 }
 0x2e1   :  { %v1304_v62 = vmul.f32 %v3182_v15, %v1287_v59 }
 0x2e3   :  { %1334 = vadd.xlane.f32.xlu0 %v1304_v62 }
 0x2e4   :  { %v2656_v0 = vpop.eup %2655 }
 0x2e5   :  { %v1272_v3 = vadd.f32 1.0, %v2656_v0  ;;  %v1313_v12 = vpop.xlane.xlu2 %1312 }
 0x2e6   :  { %v1357_v26 = vperm.slane %v1313_v12, %v2907_v43 }
 0x2e7   :  { %v1288_v4 = vmul.f32 0.5, %v1272_v3 }
 0x2e9   :  { %v1305_v6 = vmul.f32 %v3182_v15, %v1288_v4  ;;  %v1355_v15 = vperm.slane %v1309_v16, %v2907_v43 }
 0x2eb   :  { %1336 = vadd.xlane.f32.xlu1 %v1305_v6  ;;  %v1371_v30 = vsel %vm1370_vm13, %v1355_v15, %v1354_v1 }
 0x2ec   :  { %v1373_v35 = vsel %vm1372_vm14, %v1356_v19, %v1371_v30  ;;  %v1462_v30 = vperm.slane %v3213_v61, 6 }
 0x2ed   :  { %v1315_v18 = vpop.xlane.xlu2 %1314  ;;  %v1375_v38 = vsel %vm1374_vm0, %v1357_v26, %v1373_v35 }
 0x2ee   :  { %v1358_v28 = vperm.slane %v1315_v18, %v2907_v43 }
 0x2f0   :  { %v1377_v39 = vsel %vm1376_vm1, %v1358_v28, %v1375_v38 }
 0x2f5   :  { %v1317_v25 = vpop.xlane.xlu0 %1316 }
 0x2f6   :  { %v1359_v31 = vperm.slane %v1317_v25, %v2907_v43 }
 0x2f7   :  { %2556 = vperm.xlu0 %2554, %v2555_v53  }
 0x2f8   :  { %v1379_v40 = vsel %vm1378_vm3, %v1359_v31, %v1377_v39  ;;  %v1469_v31 = vperm.slane %v3213_v61, 7 }
 0x2fa   :  { %v2560_v35 = vpack.i.bf16 %v1469_v31, %v1462_v30 }
 0x2fd   :  { %v1319_v42 = vpop.xlane.xlu1 %1318 }
 0x2fe   :  { %v1360_v36 = vperm.slane %v1319_v42, %v2907_v43 }
 0x300   :  { %v1381_v44 = vsel %vm1380_vm4, %v1360_v36, %v1379_v40 }
 0x304   :  { %2544 = vperm.xlu1 %2542, %v2543_v55  }
 0x305   :  { %v1321_v29 = vpop.xlane.xlu2 %1320 }
 0x306   :  { %v1361_v32 = vperm.slane %v1321_v29, %v2907_v43 }
 0x308   :  { %v1383_v45 = vsel %vm1382_vm5, %v1361_v32, %v1381_v44 }
 0x309   :  { %v1393_v48 = vsel %vm611_vm2, %v1383_v45, -2.1474836e+09 }
 0x30a   :  { %v1396_v52 = vsel %vm1395_vm6, %v1393_v48, -inf }
 0x30d   :  { %v610_v56 = vpop.permute.xlu2 %609 }
 0x30e   :  { %vm612_vm7 = vcmp.lt.s32.totalorder %v2907_v43, %v610_v56 }
 0x30f   :  { %v3257_v57 = vsel %vm612_vm7, 1.0, %v2809_v49 }
 0x310   :  { %v1476_v58 = vperm.slane %v3257_v57, 0  ;;  %v1497_v59 = vperm.slane %v3257_v57, 3  ;;  %v1483_v36 = vperm.slane %v3257_v57, 1  ;;  %v1490_v38 = vperm.slane %v3257_v57, 2 }
 0x311   :  { %v1504_v39 = vperm.slane %v3257_v57, 4  ;;  %v1518_v45 = vperm.slane %v3257_v57, 6 }
 0x312   :  { %v2570_v62 = vpack.i.bf16 %v1497_v59, %v1476_v58  ;;  %v2565_v32 = vpack.i.bf16 %v1490_v38, %v1483_v36  ;;  %v617_v36 = vcvt.s32.f32 %v3168_v21  ;;  %v2213_v38 = vld [vmem:[#allocation8 + $0x1e8] sm:$0xff] }
 0x31e   :  { %v1323_v50 = vpop.xlane.xlu0 %1322 }
 0x31f   :  { %v1362_v9 = vperm.slane %v1323_v50, %v2907_v43 }
 0x321   :  { %1397 = vmax.xlane.f32.xlu0 %v1396_v52  ;;  %v1525_v52 = vperm.slane %v3257_v57, 7 }
 0x323   :  { %v2580_v56 = vpack.i.bf16 %v1525_v52, %v1518_v45 }
 0x326   :  { %v1325_v0 = vpop.xlane.xlu1 %1324 }
 0x327   :  { %v1363_v8 = vperm.slane %v1325_v0, %v2907_v43 }
 0x329   :  { %v1384_v12 = vsel %vm1370_vm13, %v1363_v8, %v1362_v9  ;;  %v3293_v9 = vpop.permute.xlu2 %2550 }
 0x32e   :  { %v1327_v3 = vpop.xlane.xlu0 %1326 }
 0x32f   :  { %v1364_v53 = vperm.slane %v1327_v3, %v2907_v43 }
 0x331   :  { %v1385_v16 = vsel %vm1372_vm14, %v1364_v53, %v1384_v12 }
 0x335   :  { %2571 = vperm.xlu0 %2554, %v2570_v62  }
 0x336   :  { %v1329_v4 = vpop.xlane.xlu1 %1328 }
 0x337   :  { %v1365_v49 = vperm.slane %v1329_v4, %v2907_v43 }
 0x339   :  { %v1386_v18 = vsel %vm1374_vm0, %v1365_v49, %v1385_v16 }
 0x346   :  { %v1331_v6 = vpop.xlane.xlu0 %1330 }
 0x347   :  { %v1366_v14 = vperm.slane %v1331_v6, %v2907_v43 }
 0x349   :  { %v1387_v15 = vsel %vm1376_vm1, %v1366_v14, %v1386_v18 }
 0x34e   :  { %v1333_v7 = vpop.xlane.xlu1 %1332 }
 0x34f   :  { %v1367_v55 = vperm.slane %v1333_v7, %v2907_v43 }
 0x351   :  { %v1388_v25 = vsel %vm1378_vm3, %v1367_v55, %v1387_v15 }
 0x356   :  { %v1335_v11 = vpop.xlane.xlu0 %1334 }
 0x357   :  { %v1368_v17 = vperm.slane %v1335_v11, %v2907_v43 }
 0x359   :  { %v1389_v26 = vsel %vm1380_vm4, %v1368_v17, %v1388_v25 }
 0x35e   :  { %v1337_v19 = vpop.xlane.xlu1 %1336 }
 0x35f   :  { %v1369_v1 = vperm.slane %v1337_v19, %v2907_v43  ;;  %v1511_v43 = vperm.slane %v3257_v57, 5 }
 0x361   :  { %v1390_v42 = vsel %vm1382_vm5, %v1369_v1, %v1389_v26  ;;  %v2575_v40 = vpack.i.bf16 %v1511_v43, %v1504_v39  ;;  %v2215_v1 = vld [vmem:[#allocation8 + $0x1f8] sm:$0xff] }
 0x362   :  { %v1394_v28 = vsel %vm612_vm7, %v1390_v42, -2.1474836e+09  ;;  %2281 = vmatpush.msrb.mxu3 %v2215_v1  ;;  %v2211_v43 = vld [vmem:[#allocation8 + $0x1d8] sm:$0xff] }
 0x363   :  { %v1399_v29 = vsel %vm1395_vm6, %v1394_v28, -inf }
 0x364   :  { %1400 = vmax.xlane.f32.xlu1 %v1399_v29  ;;  %2282 = vmatpush.msrb.mxu3 %v2213_v38 }
 0x366   :  { %2283 = vmatpush.msrb.mxu3 %v2211_v43 }
 0x369   :  { %v3285_v44 = vpop.permute.xlu0 %2556 }
 0x376   :  { %v3290_v3 = vpop.permute.xlu1 %2544 }
 0x37d   :  { %2561 = vperm.xlu1 %2542, %v2560_v35  }
 0x385   :  { %2566 = vperm.xlu1 %2542, %v2565_v32  }
 0x38d   :  { %2576 = vperm.xlu1 %2542, %v2575_v40  }
 0x394   :  { %v1398_v58 = vpop.xlane.xlu0 %1397 }
 0x395   :  { %v1402_v59 = vsub.f32 %v1393_v48, %v1398_v58  ;;  %2581 = vperm.xlu1 %2542, %v2580_v56   ;;  %v618_v56 = vcvt.s32.f32 %v3204_v54 }
 0x397   :  { %v1404_v62 = vmul.f32 1.442695, %v1402_v59 }
 0x399   :  { %2657 = vpow2.f32 %v1404_v62 }
 0x39f   :  { %v2658_v50 = vpop.eup %2657 }
 0x3a0   :  { %v1408_v0 = vsel %vm1395_vm6, %v2658_v50, 0.0 }
 0x3a1   :  { %1409 = vadd.xlane.f32.xlu2 %v1408_v0  ;;  %v2209_v0 = vld [vmem:[#allocation8 + $0x1c8] sm:$0xff] }
 0x3a2   :  { %2284 = vmatpush.msrb.mxu3 %v2209_v0 }
 0x3a7   :  { %v3296_v26 = vpop.permute.xlu0 %2571 }
 0x3d7   :  { %v1401_v4 = vpop.xlane.xlu1 %1400 }
 0x3d8   :  { %v1403_v6 = vsub.f32 %v1394_v28, %v1401_v4  ;;  %v2214_v4 = vld [vmem:[#allocation8 + $0x1f0] sm:$0xff] }
 0x3d9   :  { %2258 = vmatpush.msrb.mxu2 %v2214_v4 }
 0x3da   :  { %v1406_v7 = vmul.f32 1.442695, %v1403_v6  ;;  %v2212_v6 = vld [vmem:[#allocation8 + $0x1e0] sm:$0xff] }
 0x3db   :  { %2259 = vmatpush.msrb.mxu2 %v2212_v6 }
 0x3dc   :  { %2659 = vpow2.f32 %v1406_v7 }
 0x3e2   :  { %v2660_v8 = vpop.eup %2659 }
 0x3e3   :  { %v1411_v53 = vsel %vm1395_vm6, %v2660_v8, 0.0 }
 0x3e4   :  { %1412 = vadd.xlane.f32.xlu0 %v1411_v53  ;;  %v2208_v53 = vld [vmem:[#allocation8 + $0x1c0] sm:$0xff] }
 0x3ef   :  { %v3300_v45 = vpop.permute.xlu1 %2561 }
 0x3f7   :  { %v3303_v21 = vpop.permute.xlu1 %2566 }
 0x3ff   :  { %v3307_v59 = vpop.permute.xlu1 %2576 }
 0x414   :  { %v1410_v48 = vpop.xlane.xlu2 %1409 }
 0x415   :  { %2661 = vrcp.f32 %v1410_v48  ;;  %v2206_v48 = vld [vmem:[#allocation8 + $0x1b0] sm:$0xff] }
 0x41b   :  { %v2662_v49 = vpop.eup %2661 }
 0x41c   :  { %v1416_v11 = vmul.f32 %v2662_v49, %v2658_v50  ;;  %v3310_v50 = vpop.permute.xlu1 %2581 }
 0x41e   :  { %v1418_v14 = vmul.f32 %v3213_v61, %v1416_v11  ;;  %v2204_v11 = vld [vmem:[#allocation8 + $0x1a0] sm:$0xff] }
 0x420   :  { %v1765_v12 = vperm.slane %v1418_v14, 7  ;;  %v1723_v55 = vperm.slane %v1418_v14, 1  ;;  %v1716_v16 = vperm.slane %v1418_v14, 0  ;;  %v1730_v17 = vperm.slane %v1418_v14, 2 }
 0x421   :  { %v1751_v18 = vperm.slane %v1418_v14, 5  ;;  %v1737_v15 = vperm.slane %v1418_v14, 3  ;;  %v1758_v19 = vperm.slane %v1418_v14, 6  ;;  %v1744_v25 = vperm.slane %v1418_v14, 4  ;;  %v2205_v14 = vld [vmem:[#allocation8 + $0x1a8] sm:$0xff] }
 0x422   :  { %1770 = vperm.xlu2 %2548, %v1765_v12   ;;  %1728 = vperm.xlu1 %2542, %v1723_v55   ;;  %v2553_v12 = vunpack.i.h.bf16 %v3293_v9 }
 0x423   :  { %1721 = vperm.xlu0 %2554, %v1716_v16   ;;  %v2202_v16 = vld [vmem:[#allocation8 + $0x190] sm:$0xff] }
 0x42a   :  { %1735 = vperm.xlu1 %2542, %v1730_v17   ;;  %v2203_v17 = vld [vmem:[#allocation8 + $0x198] sm:$0xff] }
 0x42b   :  { %1756 = vperm.xlu0 %2554, %v1751_v18  }
 0x432   :  { %1742 = vperm.xlu1 %2542, %v1737_v15  }
 0x433   :  { %1763 = vperm.xlu0 %2554, %v1758_v19   ;;  %v2200_v19 = vld [vmem:[#allocation8 + $0x180] sm:$0xff] }
 0x43a   :  { %1749 = vperm.xlu1 %2542, %v1744_v25   ;;  %v2201_v25 = vld [vmem:[#allocation8 + $0x188] sm:$0xff] }
 0x457   :  { %v1413_v61 = vpop.xlane.xlu0 %1412 }
 0x458   :  { %2663 = vrcp.f32 %v1413_v61 }
 0x459   :  { %2665 = vrcp.f32 %v617_v36 }
 0x45a   :  { %2667 = vrcp.f32 %v618_v56 }
 0x45e   :  { %v2664_v42 = vpop.eup %2663 }
 0x45f   :  { %v1417_v28 = vmul.f32 %v2664_v42, %v2660_v8  ;;  %v2666_v52 = vpop.eup %2665  ;;  %v2210_v8 = vld [vmem:[#allocation8 + $0x1d0] sm:$0xff]  ;;  %v2552_v42 = vunpack.i.l.bf16 %v3293_v9  ;;  %v2559_v9 = vunpack.i.h.bf16 %v3285_v44 }
 0x460   :  { %v2668_v62 = vpop.eup %2667  ;;  %2260 = vmatpush.msrb.mxu2 %v2210_v8 }
 0x461   :  { %v1419_v29 = vmul.f32 %v3257_v57, %v1417_v28 }
 0x462   :  { %2261 = vmatpush.msrb.mxu2 %v2208_v53  ;;  %v1537_v53 = vmul.f32 %v2559_v9, %v3052_v41 }
 0x463   :  { %v1786_v30 = vperm.slane %v1419_v29, 2  ;;  %v1779_v31 = vperm.slane %v1419_v29, 1  ;;  %v1772_v35 = vperm.slane %v1419_v29, 0  ;;  %v1821_v32 = vperm.slane %v1419_v29, 7 }
 0x464   :  { %v1793_v39 = vperm.slane %v1419_v29, 3  ;;  %v1800_v40 = vperm.slane %v1419_v29, 4  ;;  %v1807_v57 = vperm.slane %v1419_v29, 5  ;;  %v1814_v58 = vperm.slane %v1419_v29, 6  ;;  %2262 = vmatpush.msrb.mxu2 %v2206_v48 }
 0x465   :  { %1791 = vperm.xlu1 %2542, %v1786_v30   ;;  %1784 = vperm.xlu2 %2548, %v1779_v31   ;;  %v1535_v30 = vmul.f32 %v2553_v12, %v3038_v33 }
 0x466   :  { %1777 = vperm.xlu0 %2554, %v1772_v35   ;;  %2263 = vmatpush.msrb.mxu2 %v2204_v11 }
 0x467   :  { %v1569_v43 = vsel %vm777_vm15, %v1535_v30, 0.0 }
 0x468   :  { %2264 = vmatpush.msrb.mxu2 %v2202_v16 }
 0x46a   :  { %2265 = vmatpush.msrb.mxu2 %v2200_v19 }
 0x46d   :  { %1826 = vperm.xlu1 %2542, %v1821_v32   ;;  %1798 = vperm.xlu2 %2548, %v1793_v39   ;;  %v1532_v39 = vmul.f32 %v2552_v42, %v3002_v13 }
 0x46e   :  { %1805 = vperm.xlu0 %2554, %v1800_v40  }
 0x475   :  { %1812 = vperm.xlu2 %2548, %v1807_v57  }
 0x476   :  { %2585 = vset.pattern.permute.xlu0 %v2811_v22 }
 0x477   :  { %1664 = vperm.xlu0 %2585, %v2666_v52  }
 0x47c   :  { %v1771_v28 = vpop.permute.xlu2 %1770 }
 0x47d   :  { %1819 = vperm.xlu2 %2548, %v1814_v58   ;;  %v1835_v38 = vmul.f32 %v1771_v28, %v3066_v51 }
 0x47f   :  { %2587 = vset.pattern.permute.xlu0 %v2860_v2  ;;  %v2207_v2 = vld [vmem:[#allocation8 + $0x1b8] sm:$0xff]  ;;  %v1893_v0 = vsel %vm777_vm15, %v1835_v38, 0.0 }
 0x480   :  { %2285 = vmatpush.msrb.mxu3 %v2207_v2  ;;  %v2558_v2 = vunpack.i.l.bf16 %v3285_v44 }
 0x482   :  { %2286 = vmatpush.msrb.mxu3 %v2205_v14  ;;  %v1536_v19 = vmul.f32 %v2558_v2, %v3045_v37  ;;  %v2574_v2 = vunpack.i.h.bf16 %v3296_v26 }
 0x484   :  { %2287 = vmatpush.msrb.mxu3 %v2203_v17  ;;  %v1576_v9 = vsel %vm777_vm15, %v1536_v19, 0.0 }
 0x485   :  { %2586 = vset.pattern.permute.xlu2 %v2811_v22 }
 0x486   :  { %1668 = vperm.xlu2 %2586, %v2668_v62   ;;  %2288 = vmatpush.msrb.mxu3 %v2201_v25 }
 0x494   :  { %v1729_v7 = vpop.permute.xlu1 %1728 }
 0x495   :  { %v1722_v54 = vpop.permute.xlu0 %1721  ;;  %v1829_v22 = vmul.f32 %v1729_v7, %v3014_v20  ;;  %v1570_v7 = vrot.slane %v1569_v43, 4 }
 0x496   :  { %v1828_v49 = vmul.f32 %v1722_v54, %v3002_v13  ;;  %v1548_v13 = vsel %vm777_vm15, %v1532_v39, 0.0 }
 0x497   :  { %v1851_v61 = vsel %vm777_vm15, %v1829_v22, 0.0  ;;  %v1894_v22 = vrot.slane %v1893_v0, 4  ;;  %v1549_v12 = vrot.slane %v1548_v13, 4  ;;  %v1571_v17 = vadd.f32 %v1570_v7, %v1569_v43 }
 0x498   :  { %v1844_v1 = vsel %vm777_vm15, %v1828_v49, 0.0  ;;  %v1852_v36 = vrot.slane %v1851_v61, 4 }
 0x499   :  { %v1845_v35 = vrot.slane %v1844_v1, 4  ;;  %v1895_v44 = vadd.f32 %v1894_v22, %v1893_v0 }
 0x49a   :  { %v1853_v56 = vadd.f32 %v1852_v36, %v1851_v61 }
 0x49b   :  { %v1846_v52 = vadd.f32 %v1845_v35, %v1844_v1 }
 0x49c   :  { %v1736_v55 = vpop.permute.xlu1 %1735  ;;  %v1854_v11 = vrot.slane %v1853_v56, 2 }
 0x49d   :  { %v1757_v18 = vpop.permute.xlu0 %1756  ;;  %v1830_v15 = vmul.f32 %v1736_v55, %v3025_v27 }
 0x49e   :  { %v1833_v31 = vmul.f32 %v1757_v18, %v3052_v41  ;;  %v1855_v42 = vadd.f32 %v1854_v11, %v1853_v56  ;;  %v2546_v56 = vunpack.i.l.bf16 %v3290_v3 }
 0x49f   :  { %v1858_v29 = vsel %vm777_vm15, %v1830_v15, 0.0  ;;  %v1583_v15 = vsel %vm777_vm15, %v1537_v53, 0.0 }
 0x4a0   :  { %v1859_v32 = vrot.slane %v1858_v29, 4  ;;  %v1879_v40 = vsel %vm777_vm15, %v1833_v31, 0.0  ;;  %v1572_v31 = vrot.slane %v1571_v17, 2 }
 0x4a1   :  { %v1880_v54 = vrot.slane %v1879_v40, 4 }
 0x4a2   :  { %v1860_v4 = vadd.f32 %v1859_v32, %v1858_v29  ;;  %v1550_v29 = vadd.f32 %v1549_v12, %v1548_v13  ;;  %v1584_v32 = vrot.slane %v1583_v15, 4  ;;  %v3342_v0 = vadd.f32 %v1572_v31, %v1571_v17 }
 0x4a3   :  { %v1881_v18 = vadd.f32 %v1880_v54, %v1879_v40  ;;  %v1896_v40 = vrot.slane %v1895_v44, 2  ;;  %v1577_v54 = vrot.slane %v1576_v9, 4 }
 0x4a4   :  { %v1743_v57 = vpop.permute.xlu1 %1742  ;;  %v1861_v55 = vrot.slane %v1860_v4, 2  ;;  %v1585_v13 = vadd.f32 %v1584_v32, %v1583_v15  ;;  %v2564_v15 = vunpack.i.h.bf16 %v3300_v45 }
 0x4a5   :  { %v1764_v58 = vpop.permute.xlu0 %1763  ;;  %v1831_v62 = vmul.f32 %v1743_v57, %v3038_v33  ;;  %v1847_v33 = vrot.slane %v1846_v52, 2  ;;  %v1882_v35 = vrot.slane %v1881_v18, 2 }
 0x4a6   :  { %v1834_v6 = vmul.f32 %v1764_v58, %v3059_v46  ;;  %v1862_v30 = vadd.f32 %v1861_v55, %v1860_v4  ;;  %v1856_v58 = vrot.slane %v1855_v42, 1  ;;  %v1551_v4 = vrot.slane %v1550_v29, 2 }
 0x4a7   :  { %v1865_v8 = vsel %vm777_vm15, %v1831_v62, 0.0  ;;  %v1848_v61 = vadd.f32 %v1847_v33, %v1846_v52  ;;  %v2547_v52 = vunpack.i.h.bf16 %v3290_v3  ;;  %v1533_v3 = vmul.f32 %v2546_v56, %v3014_v20 }
 0x4a8   :  { %v1886_v48 = vsel %vm777_vm15, %v1834_v6, 0.0  ;;  %v1866_v49 = vrot.slane %v1865_v8, 4  ;;  %v1883_v6 = vadd.f32 %v1882_v35, %v1881_v18  ;;  %v1857_v22 = vadd.f32 %v1856_v58, %v1855_v42 }
 0x4a9   :  { %v1887_v14 = vrot.slane %v1886_v48, 4  ;;  %v1849_v57 = vrot.slane %v1848_v61, 1  ;;  %v1534_v33 = vmul.f32 %v2547_v52, %v3025_v27  ;;  %v1552_v12 = vadd.f32 %v1551_v4, %v1550_v29 }
 0x4aa   :  { %v1867_v16 = vadd.f32 %v1866_v49, %v1865_v8  ;;  %v2573_v55 = vunpack.i.l.bf16 %v3296_v26  ;;  %v1578_v18 = vadd.f32 %v1577_v54, %v1576_v9  ;;  %v2563_v29 = vunpack.i.l.bf16 %v3300_v45 }
 0x4ab   :  { %v1888_v25 = vadd.f32 %v1887_v14, %v1886_v48  ;;  %v1897_v48 = vadd.f32 %v1896_v40, %v1895_v44  ;;  %v1850_v49 = vadd.f32 %v1849_v57, %v1848_v61  ;;  %v1562_v20 = vsel %vm777_vm15, %v1534_v33, 0.0 }
 0x4ac   :  { %v1868_v41 = vrot.slane %v1867_v16, 2  ;;  %v1750_v1 = vpop.permute.xlu1 %1749  ;;  %v1555_v61 = vsel %vm777_vm15, %v1533_v3, 0.0  ;;  %v1539_v35 = vmul.f32 %v2564_v15, %v3066_v51  ;;  %v1574_v57 = vrot.slane %v3342_v0, 1 }
 0x4ad   :  { %v1832_v28 = vmul.f32 %v1750_v1, %v3045_v37  ;;  %v1889_v39 = vrot.slane %v1888_v25, 2  ;;  %v1863_v37 = vrot.slane %v1862_v30, 1  ;;  %v1543_v1 = vmul.f32 %v2574_v2, %v3106_v34 }
 0x4ae   :  { %v1869_v36 = vadd.f32 %v1868_v41, %v1867_v16  ;;  %v1884_v16 = vrot.slane %v1883_v6, 1  ;;  %v1586_v41 = vrot.slane %v1585_v13, 2  ;;  %v1898_v44 = vrot.slane %v1897_v48, 1 }
 0x4af   :  { %v1872_v38 = vsel %vm777_vm15, %v1832_v28, 0.0  ;;  %v1890_v8 = vadd.f32 %v1889_v39, %v1888_v25  ;;  %v1864_v11 = vadd.f32 %v1863_v37, %v1862_v30  ;;  %v2232_v27 = vsel %vm1370_vm13, %v1857_v22, %v1850_v49 }
 0x4b0   :  { %v1873_v43 = vrot.slane %v1872_v38, 4  ;;  %v1870_v7 = vrot.slane %v1869_v36, 1  ;;  %v1540_v28 = vmul.f32 %v2573_v55, %v3079_v63  ;;  %v1885_v30 = vadd.f32 %v1884_v16, %v1883_v6 }
 0x4b1   :  { %v1891_v19 = vrot.slane %v1890_v8, 1  ;;  %v2233_v42 = vsel %vm1372_vm14, %v1864_v11, %v2232_v27  ;;  %v1625_v39 = vsel %vm777_vm15, %v1543_v1, 0.0  ;;  %v1899_v9 = vadd.f32 %v1898_v44, %v1897_v48 }
 0x4b2   :  { %v1874_v62 = vadd.f32 %v1873_v43, %v1872_v38  ;;  %v1871_v17 = vadd.f32 %v1870_v7, %v1869_v36  ;;  %v2569_v36 = vunpack.i.h.bf16 %v3303_v21  ;;  %v2568_v43 = vunpack.i.l.bf16 %v3303_v21 }
 0x4b3   :  { %v1892_v38 = vadd.f32 %v1891_v19, %v1890_v8  ;;  %v2579_v45 = vunpack.i.h.bf16 %v3307_v59  ;;  %v2578_v58 = vunpack.i.l.bf16 %v3307_v59  ;;  %v1563_v52 = vrot.slane %v1562_v20, 4 }
 0x4b4   :  { %v1875_v53 = vrot.slane %v1874_v62, 2  ;;  %v2234_v31 = vsel %vm1374_vm0, %v1871_v17, %v2233_v42  ;;  %v1604_v56 = vsel %vm777_vm15, %v1540_v28, 0.0  ;;  %v1538_v37 = vmul.f32 %v2563_v29, %v3059_v46 }
 0x4b5   :  { %v1556_v21 = vrot.slane %v1555_v61, 4  ;;  %v1626_v6 = vrot.slane %v1625_v39, 4  ;;  %v1597_v7 = vsel %vm777_vm15, %v1539_v35, 0.0  ;;  %v1542_v54 = vmul.f32 %v2569_v36, %v3095_v23 }
 0x4b6   :  { %v1876_v14 = vadd.f32 %v1875_v53, %v1874_v62  ;;  %v1553_v59 = vrot.slane %v1552_v12, 1  ;;  %v1587_v8 = vadd.f32 %v1586_v41, %v1585_v13  ;;  %v1579_v53 = vrot.slane %v1578_v18, 2 }
 0x4b7   :  { %v1541_v2 = vmul.f32 %v2568_v43, %v3086_v10  ;;  %v3376_v46 = vadd.f32 %v1574_v57, %v3342_v0  ;;  %v1605_v48 = vrot.slane %v1604_v56, 4  ;;  %v1545_v49 = vmul.f32 %v2579_v45, %v3129_v24 }
 0x4b8   :  { %v1877_v25 = vrot.slane %v1876_v14, 1  ;;  %v1544_v22 = vmul.f32 %v2578_v58, %v3121_v5  ;;  %v1564_v33 = vadd.f32 %v1563_v52, %v1562_v20  ;;  %v1598_v3 = vrot.slane %v1597_v7, 4  ;;  %v2098_v52 = vld [vmem:[#allocation8 + $0x160] sm:$0xff] }
 0x4b9   :  { %v1590_v11 = vsel %vm777_vm15, %v1538_v37, 0.0  ;;  %v1557_v55 = vadd.f32 %v1556_v21, %v1555_v61  ;;  %v1627_v16 = vadd.f32 %v1626_v6, %v1625_v39  ;;  %v1618_v13 = vsel %vm777_vm15, %v1542_v54, 0.0  ;;  %v2096_v54 = vld [vmem:[#allocation8 + $0x150] sm:$0xff] }
 0x4ba   :  { %v1878_v26 = vadd.f32 %v1877_v25, %v1876_v14  ;;  %v2583_v14 = vunpack.i.l.bf16 %v3310_v50  ;;  %v2584_v17 = vunpack.i.h.bf16 %v3310_v50  ;;  %v3384_v15 = vadd.f32 %v1553_v59, %v1552_v12  ;;  %v2097_v59 = vld [vmem:[#allocation8 + $0x158] sm:$0xff] }
 0x4bb   :  { %v1588_v0 = vrot.slane %v1587_v8, 1  ;;  %v1580_v19 = vadd.f32 %v1579_v53, %v1578_v18  ;;  %v1611_v25 = vsel %vm777_vm15, %v1541_v2, 0.0  ;;  %v1606_v41 = vadd.f32 %v1605_v48, %v1604_v56  ;;  %v2099_v56 = vld [vmem:[#allocation8 + $0x168] sm:$0xff] }
 0x4bc   :  { %v2235_v32 = vsel %vm1376_vm1, %v1878_v26, %v2234_v31  ;;  %v1591_v1 = vrot.slane %v1590_v11, 4  ;;  %v1639_v44 = vsel %vm777_vm15, %v1545_v49, 0.0  ;;  %v1632_v27 = vsel %vm777_vm15, %v1544_v22, 0.0  ;;  %v2094_v49 = vld [vmem:[#allocation8 + $0x140] sm:$0xff]  ;;  %v2095_v22 = vld [vmem:[#allocation8 + $0x148] sm:$0xff] }
 0x4bd   :  { %v2236_v40 = vsel %vm1378_vm3, %v1885_v30, %v2235_v32  ;;  %v1565_v20 = vrot.slane %v1564_v33, 2  ;;  %v1599_v42 = vadd.f32 %v1598_v3, %v1597_v7  ;;  %v1619_v61 = vrot.slane %v1618_v13, 4  ;;  %v2101_v32 = vld [vmem:[#allocation8 + $0x178] sm:$0xff] }
 0x4be   :  { %v2237_v51 = vsel %vm1380_vm4, %v1892_v38, %v2236_v40  ;;  %v1546_v26 = vmul.f32 %v2583_v14, %v3137_v47  ;;  %v1558_v29 = vrot.slane %v1557_v55, 2  ;;  %v1628_v50 = vrot.slane %v1627_v16, 2  ;;  %v2100_v38 = vld [vmem:[#allocation8 + $0x170] sm:$0xff]  ;;  %2181 = vmatpush.msrb.mxu1 %v2101_v32 }
 0x4bf   :  { %v1785_v62 = vpop.permute.xlu2 %1784  ;;  %v2238_v4 = vsel %vm1382_vm5, %v1899_v9, %v2237_v51  ;;  %v1612_v12 = vrot.slane %v1611_v25, 4  ;;  %v1547_v30 = vmul.f32 %v2584_v17, %v3144_v60  ;;  %v1640_v18 = vrot.slane %v1639_v44, 4  ;;  %2158 = vmatpush.msra.mxu0 %v2100_v38 }
 0x4c0   :  { %2499 = vmatmul.msk.f32.vlgmr.msrb.gmra.mxu2 %vm777_vm15, %v2238_v4  ;;  %2501 = vmatmul.msk.f32.vlgmr.msrb.gmra.mxu3 %vm777_vm15, %v2238_v4  ;;  %v1633_v31 = vrot.slane %v1632_v27, 4  ;;  %v1837_v35 = vmul.f32 %v1785_v62, %v3086_v10  ;;  %v3393_v39 = vadd.f32 %v1588_v0, %v1587_v8  ;;  %v1581_v43 = vrot.slane %v1580_v19, 1 }
 0x4c1   :  { %v1607_v9 = vrot.slane %v1606_v41, 2  ;;  %v1592_v40 = vadd.f32 %v1591_v1, %v1590_v11  ;;  %v1566_v57 = vadd.f32 %v1565_v20, %v1564_v33  ;;  %v1600_v45 = vrot.slane %v1599_v42, 2  ;;  %2159 = vmatpush.msra.mxu0 %v2098_v52  ;;  %2182 = vmatpush.msrb.mxu1 %v2099_v56  ;;  %v2090_v20 = vld [vmem:[#allocation8 + $0x120] sm:$0xff] }
 0x4c2   :  { %v1620_v58 = vadd.f32 %v1619_v61, %v1618_v13  ;;  %v1646_v51 = vsel %vm777_vm15, %v1546_v26, 0.0  ;;  %v1559_v37 = vadd.f32 %v1558_v29, %v1557_v55  ;;  %v1629_v10 = vadd.f32 %v1628_v50, %v1627_v16  ;;  %v2092_v16 = vld [vmem:[#allocation8 + $0x130] sm:$0xff]  ;;  %v2093_v13 = vld [vmem:[#allocation8 + $0x138] sm:$0xff]  ;;  %v2091_v61 = vld [vmem:[#allocation8 + $0x128] sm:$0xff] }
 0x4c3   :  { %v1613_v62 = vadd.f32 %v1612_v12, %v1611_v25  ;;  %v1641_v4 = vadd.f32 %v1640_v18, %v1639_v44  ;;  %v1634_v21 = vadd.f32 %v1633_v31, %v1632_v27  ;;  %v1907_v6 = vsel %vm777_vm15, %v1837_v35, 0.0  ;;  %2160 = vmatpush.msra.mxu0 %v2096_v54  ;;  %2183 = vmatpush.msrb.mxu1 %v2097_v59  ;;  %v2089_v31 = vld [vmem:[#allocation8 + $0x118] sm:$0xff] }
 0x4c4   :  { %v3399_v8 = vadd.f32 %v1581_v43, %v1580_v19  ;;  %v1608_v53 = vadd.f32 %v1607_v9, %v1606_v41  ;;  %v1593_v2 = vrot.slane %v1592_v40, 2  ;;  %v1647_v48 = vrot.slane %v1646_v51, 4 }
 0x4c5   :  { %v1567_v33 = vrot.slane %v1566_v57, 1  ;;  %v1601_v3 = vadd.f32 %v1600_v45, %v1599_v42  ;;  %v1621_v11 = vrot.slane %v1620_v58, 2  ;;  %v1560_v17 = vrot.slane %v1559_v37, 1  ;;  %2161 = vmatpush.msra.mxu0 %v2094_v49  ;;  %2184 = vmatpush.msrb.mxu1 %v2095_v22  ;;  %v2086_v45 = vld [vmem:[#allocation8 + $0x100] sm:$0xff] }
 0x4c6   :  { %v1908_v0 = vrot.slane %v1907_v6, 4  ;;  %v1630_v41 = vrot.slane %v1629_v10, 1  ;;  %v1614_v1 = vrot.slane %v1613_v62, 2  ;;  %v1642_v44 = vrot.slane %v1641_v4, 2 }
 0x4c7   :  { %v1799_v28 = vpop.permute.xlu2 %1798  ;;  %v1635_v27 = vrot.slane %v1634_v21, 2  ;;  %v1609_v26 = vrot.slane %v1608_v53, 1  ;;  %v1594_v42 = vadd.f32 %v1593_v2, %v1592_v40  ;;  %2162 = vmatpush.msra.mxu0 %v2092_v16  ;;  %2185 = vmatpush.msrb.mxu1 %v2093_v13  ;;  %v1602_v50 = vrot.slane %v1601_v3, 1 }
 0x4c8   :  { %v1839_v36 = vmul.f32 %v1799_v28, %v3106_v34  ;;  %v1653_v34 = vsel %vm777_vm15, %v1547_v30, 0.0  ;;  %v1648_v28 = vadd.f32 %v1647_v48, %v1646_v51  ;;  %v1622_v12 = vadd.f32 %v1621_v11, %v1620_v58  ;;  %v2087_v51 = vld [vmem:[#allocation8 + $0x108] sm:$0xff] }
 0x4c9   :  { %v1654_v14 = vrot.slane %v1653_v34, 4  ;;  %v3403_v35 = vadd.f32 %v1567_v33, %v1566_v57  ;;  %2163 = vmatpush.msra.mxu0 %v2090_v20  ;;  %2186 = vmatpush.msrb.mxu1 %v2091_v61  ;;  %v3405_v32 = vadd.f32 %v1560_v17, %v1559_v37  ;;  %v1615_v43 = vadd.f32 %v1614_v1, %v1613_v62 }
 0x4ca   :  { %v1921_v7 = vsel %vm777_vm15, %v1839_v36, 0.0  ;;  %v1909_v36 = vadd.f32 %v1908_v0, %v1907_v6  ;;  %v1643_v9 = vadd.f32 %v1642_v44, %v1641_v4  ;;  %v1636_v40 = vadd.f32 %v1635_v27, %v1634_v21 }
 0x4cb   :  { %v1922_v25 = vrot.slane %v1921_v7, 4  ;;  %v1655_v30 = vadd.f32 %v1654_v14, %v1653_v34  ;;  %v3407_v52 = vadd.f32 %v1630_v41, %v1629_v10  ;;  %v3409_v58 = vadd.f32 %v1609_v26, %v1608_v53  ;;  %2187 = vmatpush.msrb.mxu1 %v2089_v31 }
 0x4cc   :  { %v1649_v56 = vrot.slane %v1648_v28, 2  ;;  %v3411_v57 = vadd.f32 %v1602_v50, %v1601_v3  ;;  %v1595_v6 = vrot.slane %v1594_v42, 1  ;;  %v1910_v62 = vrot.slane %v1909_v36, 2 }
 0x4cd   :  { %v1923_v38 = vadd.f32 %v1922_v25, %v1921_v7  ;;  %v1623_v7 = vrot.slane %v1622_v12, 1  ;;  %v1656_v54 = vrot.slane %v1655_v30, 2  ;;  %2188 = vmatpush.msrb.mxu1 %v2087_v51  ;;  %v1616_v53 = vrot.slane %v1615_v43, 1 }
 0x4ce   :  { %v1644_v48 = vrot.slane %v1643_v9, 1  ;;  %v1637_v49 = vrot.slane %v1636_v40, 1  ;;  %v1650_v33 = vadd.f32 %v1649_v56, %v1648_v28  ;;  %v1911_v17 = vadd.f32 %v1910_v62, %v1909_v36 }
 0x4cf   :  { %v1813_v55 = vpop.permute.xlu2 %1812  ;;  %v1924_v4 = vrot.slane %v1923_v38, 2  ;;  %v1617_v41 = vadd.f32 %v1616_v53, %v1615_v43 }
 0x4d0   :  { %v1841_v19 = vmul.f32 %v1813_v55, %v3129_v24  ;;  %v2088_v24 = vld [vmem:[#allocation8 + $0x110] sm:$0xff]  ;;  %v3418_v55 = vadd.f32 %v1656_v54, %v1655_v30  ;;  %v3423_v44 = vadd.f32 %v1644_v48, %v1643_v9  ;;  %v1651_v27 = vrot.slane %v1650_v33, 1 }
 0x4d1   :  { %2164 = vmatpush.msra.mxu0 %v2088_v24  ;;  %v1925_v0 = vadd.f32 %v1924_v4, %v1923_v38  ;;  %v1638_v26 = vadd.f32 %v1637_v49, %v1636_v40 }
 0x4d2   :  { %v1935_v29 = vsel %vm777_vm15, %v1841_v19, 0.0  ;;  %v1624_v19 = vadd.f32 %v1623_v7, %v1622_v12  ;;  %v1658_v30 = vrot.slane %v3418_v55, 1  ;;  %v3431_v40 = vadd.f32 %v1651_v27, %v1650_v33 }
 0x4d3   :  { %v1936_v18 = vrot.slane %v1935_v29, 4  ;;  %2165 = vmatpush.msra.mxu0 %v2086_v45 }
 0x4d5   :  { %v1937_v34 = vadd.f32 %v1936_v18, %v1935_v29  ;;  %v1926_v18 = vrot.slane %v1925_v0, 1 }
 0x4d7   :  { %v1820_v37 = vpop.permute.xlu2 %1819  ;;  %v1792_v59 = vpop.permute.xlu1 %1791  ;;  %v1938_v3 = vrot.slane %v1937_v34, 2 }
 0x4d8   :  { %v1842_v21 = vmul.f32 %v1820_v37, %v3137_v47  ;;  %v1778_v2 = vpop.permute.xlu0 %1777  ;;  %v1838_v10 = vmul.f32 %v1792_v59, %v3095_v23  ;;  %v3421_v23 = vadd.f32 %v1595_v6, %v1594_v42  ;;  %v1912_v42 = vrot.slane %v1911_v17, 1 }
 0x4d9   :  { %v1836_v22 = vmul.f32 %v1778_v2, %v3079_v63  ;;  %v1939_v20 = vadd.f32 %v1938_v3, %v1937_v34 }
 0x4da   :  { %v1942_v11 = vsel %vm777_vm15, %v1842_v21, 0.0  ;;  %v1914_v14 = vsel %vm777_vm15, %v1838_v10, 0.0  ;;  %v1913_v21 = vadd.f32 %v1912_v42, %v1911_v17 }
 0x4db   :  { %v1943_v16 = vrot.slane %v1942_v11, 4  ;;  %v1900_v47 = vsel %vm777_vm15, %v1836_v22, 0.0  ;;  %v1915_v13 = vrot.slane %v1914_v14, 4  ;;  %v1940_v51 = vrot.slane %v1939_v20, 1 }
 0x4dc   :  { %v1901_v25 = vrot.slane %v1900_v47, 4 }
 0x4dd   :  { %v1944_v63 = vadd.f32 %v1943_v16, %v1942_v11  ;;  %v1916_v1 = vadd.f32 %v1915_v13, %v1914_v14  ;;  %v1941_v53 = vadd.f32 %v1940_v51, %v1939_v20 }
 0x4de   :  { %v1902_v61 = vadd.f32 %v1901_v25, %v1900_v47 }
 0x4df   :  { %v1945_v28 = vrot.slane %v1944_v63, 2  ;;  %v1917_v29 = vrot.slane %v1916_v1, 2  ;;  %v1827_v50 = vpop.permute.xlu1 %1826 }
 0x4e0   :  { %v1903_v24 = vrot.slane %v1902_v61, 2  ;;  %v1806_v31 = vpop.permute.xlu0 %1805  ;;  %v1843_v12 = vmul.f32 %v1827_v50, %v3144_v60  ;;  %v3427_v36 = vpop.permute.xlu2 %1668 }
 0x4e1   :  { %v1946_v38 = vadd.f32 %v1945_v28, %v1944_v63  ;;  %v1918_v43 = vadd.f32 %v1917_v29, %v1916_v1  ;;  %v1840_v9 = vmul.f32 %v1806_v31, %v3121_v5  ;;  %v1677_v45 = vrot.slane %v3427_v36, 1 }
 0x4e2   :  { %v1904_v56 = vadd.f32 %v1903_v24, %v1902_v61  ;;  %v1949_v34 = vsel %vm777_vm15, %v1843_v12, 0.0  ;;  %v1678_v62 = vrot.slane %v3427_v36, 2  ;;  %v1927_v5 = vadd.f32 %v1926_v18, %v1925_v0 }
 0x4e3   :  { %v1947_v6 = vrot.slane %v1946_v38, 1  ;;  %v1919_v7 = vrot.slane %v1918_v43, 1  ;;  %v1928_v54 = vsel %vm777_vm15, %v1840_v9, 0.0  ;;  %v1950_v37 = vrot.slane %v1949_v34, 4 }
 0x4e4   :  { %v1905_v60 = vrot.slane %v1904_v56, 1  ;;  %v1929_v59 = vrot.slane %v1928_v54, 4  ;;  %v1709_v4 = vmul.f32 %v1677_v45, %v1617_v41  ;;  %v1679_v10 = vrot.slane %v3427_v36, 3 }
 0x4e5   :  { %v1951_v2 = vadd.f32 %v1950_v37, %v1949_v34  ;;  %v1708_v22 = vmul.f32 %v3427_v36, %v3409_v58  ;;  %v1948_v33 = vadd.f32 %v1947_v6, %v1946_v38  ;;  %v1920_v3 = vadd.f32 %v1919_v7, %v1918_v43 }
 0x4e6   :  { %v1906_v48 = vadd.f32 %v1905_v60, %v1904_v56  ;;  %v1930_v49 = vadd.f32 %v1929_v59, %v1928_v54  ;;  %v1680_v14 = vrot.slane %v3427_v36, 4  ;;  %v1710_v13 = vmul.f32 %v1678_v62, %v1624_v19 }
 0x4e7   :  { %v1952_v11 = vrot.slane %v1951_v2, 2  ;;  %v2132_v17 = vrot.slane %v1709_v4, 7  ;;  %v1681_v41 = vrot.slane %v3427_v36, 5  ;;  %v1682_v63 = vrot.slane %v3427_v36, 6 }
 0x4e8   :  { %v2239_v16 = vsel %vm1370_vm13, %v1913_v21, %v1906_v48  ;;  %v1931_v47 = vrot.slane %v1930_v49, 2  ;;  %v1711_v1 = vmul.f32 %v1679_v10, %v3407_v52  ;;  %v1712_v42 = vmul.f32 %v1680_v14, %v1638_v26 }
 0x4e9   :  { %v1953_v0 = vadd.f32 %v1952_v11, %v1951_v2  ;;  %v1665_v25 = vpop.permute.xlu0 %1664  ;;  %v2240_v28 = vsel %vm1372_vm14, %v1920_v3, %v2239_v16  ;;  %v1713_v52 = vmul.f32 %v1681_v41, %v3423_v44  ;;  %v2134_v21 = vrot.slane %v1710_v13, 6  ;;  %v673_v41 = vld [vmem:[#allocation7 + $0x1b0] sm:$0xff] }
 0x4ea   :  { %v1932_v27 = vadd.f32 %v1931_v47, %v1930_v49  ;;  %v1670_v58 = vrot.slane %v1665_v25, 1  ;;  %v1671_v20 = vrot.slane %v1665_v25, 2  ;;  %v1672_v61 = vrot.slane %v1665_v25, 3 }
 0x4eb   :  { %v1673_v29 = vrot.slane %v1665_v25, 4  ;;  %v1674_v50 = vrot.slane %v1665_v25, 5  ;;  %v1954_v12 = vrot.slane %v1953_v0, 1  ;;  %v1675_v38 = vrot.slane %v1665_v25, 6 }
 0x4ec   :  { %v1933_v18 = vrot.slane %v1932_v27, 1  ;;  %v1701_v19 = vmul.f32 %v1670_v58, %v3405_v32  ;;  %v1702_v24 = vmul.f32 %v1671_v20, %v3403_v35  ;;  %v1703_v31 = vmul.f32 %v1672_v61, %v3376_v46  ;;  %v671_v58 = vld [vmem:[#allocation7 + $0x1a0] sm:$0xff]  ;;  %v670_v61 = vld [vmem:[#allocation7 + $0x198] sm:$0xff] }
 0x4ed   :  { %v1676_v43 = vrot.slane %v1665_v25, 7  ;;  %v1700_v45 = vmul.f32 %v1665_v25, %v3384_v15  ;;  %v2241_v34 = vsel %vm1374_vm0, %v1927_v5, %v2240_v28  ;;  %v1704_v26 = vmul.f32 %v1673_v29, %v3399_v8  ;;  %v687_v20 = vld [vmem:[#allocation7 + $0x220] sm:$0xff]  ;;  %v686_v28 = vld [vmem:[#allocation7 + $0x218] sm:$0xff]  ;;  %v669_v29 = vld [vmem:[#allocation7 + $0x190] sm:$0xff] }
 0x4ee   :  { %v1934_v9 = vadd.f32 %v1933_v18, %v1932_v27  ;;  %v2118_v51 = vrot.slane %v1701_v19, 7  ;;  %v2120_v56 = vrot.slane %v1702_v24, 6  ;;  %v1705_v32 = vmul.f32 %v1674_v50, %v3393_v39  ;;  %v688_v27 = vld [vmem:[#allocation7 + $0x228] sm:$0xff]  ;;  %v685_v50 = vld [vmem:[#allocation7 + $0x210] sm:$0xff]  ;;  %v667_v19 = vld [vmem:[#allocation7 + $0x180] sm:$0xff] }
 0x4ef   :  { %v1706_v35 = vmul.f32 %v1675_v38, %v3421_v23  ;;  %v2122_v6 = vrot.slane %v1703_v31, 5  ;;  %v1707_v7 = vmul.f32 %v1676_v43, %v3411_v57  ;;  %v1955_v54 = vadd.f32 %v1954_v12, %v1953_v0  ;;  %v684_v18 = vld [vmem:[#allocation7 + $0x208] sm:$0xff]  ;;  %v683_v24 = vld [vmem:[#allocation7 + $0x200] sm:$0xff]  ;;  %v666_v31 = vld [vmem:[#allocation7 + $0x178] sm:$0xff] }
 0x4f0   :  { %v2242_v46 = vsel %vm1376_vm1, %v1934_v9, %v2241_v34  ;;  %v2119_v44 = vsel %vm1370_vm13, %v2118_v51, %v1700_v45  ;;  %v2124_v60 = vrot.slane %v1704_v26, 4  ;;  %v2126_v39 = vrot.slane %v1705_v32, 3  ;;  %v682_v12 = vld [vmem:[#allocation7 + $0x1f8] sm:$0xff]  ;;  %v665_v38 = vld [vmem:[#allocation7 + $0x170] sm:$0xff]  ;;  %v680_v9 = vld [vmem:[#allocation7 + $0x1e8] sm:$0xff]  ;;  %v2005_v45 = vpop.f32.mrf.mxu2 }
 0x4f1   :  { %v2243_v15 = vsel %vm1378_vm3, %v1941_v53, %v2242_v46  ;;  %v2121_v37 = vsel %vm1372_vm14, %v2120_v56, %v2119_v44  ;;  %v2133_v23 = vsel %vm1370_vm13, %v2132_v17, %v1708_v22  ;;  %v2128_v57 = vrot.slane %v1706_v35, 2  ;;  %v681_v43 = vld [vmem:[#allocation7 + $0x1f0] sm:$0xff]  ;;  %v663_v51 = vld [vmem:[#allocation7 + $0x160] sm:$0xff]  ;;  %v662_v34 = vld [vmem:[#allocation7 + $0x158] sm:$0xff] }
 0x4f2   :  { %v2244_v59 = vsel %vm1380_vm4, %v1948_v33, %v2243_v15  ;;  %v2123_v8 = vsel %vm1374_vm0, %v2122_v6, %v2121_v37  ;;  %v2130_v2 = vrot.slane %v1707_v7, 1  ;;  %v1683_v10 = vrot.slane %v3427_v36, 7  ;;  %v679_v56 = vld [vmem:[#allocation7 + $0x1e0] sm:$0xff]  ;;  %v678_v32 = vld [vmem:[#allocation7 + $0x1d8] sm:$0xff]  ;;  %v661_v35 = vld [vmem:[#allocation7 + $0x150] sm:$0xff]  ;;  %v2057_v15 = vpop.f32.mrf.mxu1  ;;  %v2028_v37 = vpop.f32.mrf.mxu0 }
 0x4f3   :  { %v2245_v62 = vsel %vm1382_vm5, %v1955_v54, %v2244_v59  ;;  %v2125_v4 = vsel %vm1376_vm1, %v2124_v60, %v2123_v8  ;;  %v2136_v53 = vrot.slane %v1711_v1, 5  ;;  %v1714_v49 = vmul.f32 %v1682_v63, %v3431_v40  ;;  %v689_v63 = vld [vmem:[#allocation7 + $0x230] sm:$0xff]  ;;  %v672_v1 = vld [vmem:[#allocation7 + $0x1a8] sm:$0xff]  ;;  %v659_v44 = vld [vmem:[#allocation7 + $0x140] sm:$0xff] }
 0x4f4   :  { %2500 = vmatmul.msk.f32.gmra.mxu2 %vm777_vm15, %v2245_v62  ;;  %2502 = vmatmul.msk.f32.gmra.mxu3 %vm777_vm15, %v2245_v62  ;;  %v2127_v5 = vsel %vm1378_vm3, %v2126_v39, %v2125_v4  ;;  %v2135_v22 = vsel %vm1372_vm14, %v2134_v21, %v2133_v23  ;;  %v2138_v33 = vrot.slane %v1712_v42, 4  ;;  %v1659_v11 = vadd.f32 %v1658_v30, %v3418_v55  ;;  %v674_v55 = vld [vmem:[#allocation7 + $0x1b8] sm:$0xff]  ;;  %v668_v42 = vld [vmem:[#allocation7 + $0x188] sm:$0xff]  ;;  %v677_v6 = vld [vmem:[#allocation7 + $0x1d0] sm:$0xff] }
 0x4f5   :  { %v2129_v48 = vsel %vm1380_vm4, %v2128_v57, %v2127_v5  ;;  %v2137_v14 = vsel %vm1374_vm0, %v2136_v53, %v2135_v22  ;;  %v2140_v16 = vrot.slane %v1713_v52, 3  ;;  %v2142_v13 = vrot.slane %v1714_v49, 2  ;;  %v690_v30 = vld [vmem:[#allocation7 + $0x238] sm:$0xff]  ;;  %2316 = vmatpush.msrb.mxu0 %v674_v55  ;;  %v664_v52 = vld [vmem:[#allocation7 + $0x168] sm:$0xff]  ;;  %v675_v54 = vld [vmem:[#allocation7 + $0x1c0] sm:$0xff] }
 0x4f6   :  { %v2131_v3 = vsel %vm1382_vm5, %v2130_v2, %v2129_v48  ;;  %v2139_v36 = vsel %vm1376_vm1, %v2138_v33, %v2137_v14  ;;  %v1715_v47 = vmul.f32 %v1683_v10, %v1659_v11  ;;  %2339 = vmatpush.msra.mxu1 %v690_v30  ;;  %v660_v46 = vld [vmem:[#allocation7 + $0x148] sm:$0xff]  ;;  %v706_v59 = vld [vmem:[#allocation7 + $0x2b8] sm:$0xff]  ;;  %v705_v8 = vld [vmem:[#allocation7 + $0x2b0] sm:$0xff]  ;;  %v2058_v48 = vadd.f32 %v2057_v15, %v2005_v45 }
 0x4f7   :  { %2495 = vmatmul.msk.f32.vlgmr.msra.gmra.mxu0 %vm777_vm15, %v2131_v3  ;;  %2497 = vmatmul.msk.f32.vlgmr.msrb.gmra.mxu1 %vm777_vm15, %v2131_v3  ;;  %v2141_v40 = vsel %vm1378_vm3, %v2140_v16, %v2139_v36  ;;  %v676_v7 = vld [vmem:[#allocation7 + $0x1c8] sm:$0xff]  ;;  %v703_v23 = vld [vmem:[#allocation7 + $0x2a0] sm:$0xff]  ;;  %v702_v62 = vld [vmem:[#allocation7 + $0x298] sm:$0xff] }
 0x4f8   :  { %v2143_v17 = vsel %vm1380_vm4, %v2142_v13, %v2141_v40  ;;  %v2144_v0 = vrot.slane %v1715_v47, 1  ;;  %2317 = vmatpush.msrb.mxu0 %v673_v41  ;;  %2340 = vmatpush.msra.mxu1 %v689_v63  ;;  %v2008_v26 = vpop.f32.mrf.mxu2  ;;  %v704_v39 = vld [vmem:[#allocation7 + $0x2a8] sm:$0xff]  ;;  %v701_v21 = vld [vmem:[#allocation7 + $0x290] sm:$0xff]  ;;  %v699_v10 = vld [vmem:[#allocation7 + $0x280] sm:$0xff] }
 0x4f9   :  { %2365 = vmatpush.msra.mxu2 %v706_v59  ;;  %v700_v2 = vld [vmem:[#allocation7 + $0x288] sm:$0xff]  ;;  %v698_v22 = vld [vmem:[#allocation7 + $0x278] sm:$0xff]  ;;  %v697_v47 = vld [vmem:[#allocation7 + $0x270] sm:$0xff] }
 0x4fa   :  { %v2145_v25 = vsel %vm1382_vm5, %v2144_v0, %v2143_v17  ;;  %2318 = vmatpush.msrb.mxu0 %v672_v1  ;;  %2341 = vmatpush.msra.mxu1 %v688_v27  ;;  %v2060_v4 = vpop.f32.mrf.mxu1  ;;  %v2031_v57 = vpop.f32.mrf.mxu0  ;;  %v2301_v53 = vld [vmem:[#allocation8 + $0x200] ss:$8 sm:$0x3]  ;;  %v695_v41 = vld [vmem:[#allocation7 + $0x260] sm:$0xff] }
 0x4fb   :  { %2366 = vmatpush.msra.mxu2 %v705_v8  ;;  %v2303_v14 = vperm.slane %v2301_v53, 0  ;;  %v2304_v36 = vperm.slane %v2301_v53, 1  ;;  %v2061_v63 = vadd.f32 %v2060_v4, %v2008_v26  ;;  %v691_v45 = vld [vmem:[#allocation7 + $0x240] sm:$0xff] }
 0x4fc   :  { %2319 = vmatpush.msrb.mxu0 %v671_v58  ;;  %2342 = vmatpush.msra.mxu1 %v687_v20  ;;  %v2592_v15 = vld [vmem:[#allocation7 + $0x2c4] ss:$0 sm:$0xff] }
 0x4fd   :  { %2367 = vmatpush.msra.mxu2 %v704_v39 }
 0x4fe   :  { %2320 = vmatpush.msrb.mxu0 %v670_v61  ;;  %2343 = vmatpush.msra.mxu1 %v686_v28 }
 0x4ff   :  { %2496 = vmatmul.msk.f32.gmra.mxu0 %vm777_vm15, %v2145_v25  ;;  %2498 = vmatmul.msk.f32.gmra.mxu1 %vm777_vm15, %v2145_v25  ;;  %v696_v25 = vld [vmem:[#allocation7 + $0x268] sm:$0xff] }
 0x500   :  { %2321 = vmatpush.msrb.mxu0 %v669_v29  ;;  %2344 = vmatpush.msra.mxu1 %v685_v50  ;;  %v2080_v60 = vpop.f32.mrf.mxu2 }
 0x501   :  { %2368 = vmatpush.msra.mxu2 %v703_v23  ;;  %v2081_v49 = vadd.f32 %v2080_v60, %v2028_v37 }
 0x502   :  { %2322 = vmatpush.msrb.mxu0 %v668_v42  ;;  %2345 = vmatpush.msra.mxu1 %v684_v18 }
 0x503   :  { %2369 = vmatpush.msra.mxu2 %v702_v62 }
 0x504   :  { %2323 = vmatpush.msrb.mxu0 %v667_v19  ;;  %2346 = vmatpush.msra.mxu1 %v683_v24 }
 0x505   :  { %2370 = vmatpush.msra.mxu2 %v701_v21 }
 0x506   :  { %2324 = vmatpush.msrb.mxu0 %v666_v31  ;;  %2347 = vmatpush.msra.mxu1 %v682_v12 }
 0x507   :  { %2371 = vmatpush.msra.mxu2 %v700_v2 }
 0x508   :  { %2325 = vmatpush.msrb.mxu0 %v665_v38  ;;  %2348 = vmatpush.msra.mxu1 %v681_v43  ;;  %v2083_v5 = vpop.f32.mrf.mxu2  ;;  %v694_v43 = vld [vmem:[#allocation7 + $0x258] sm:$0xff] }
 0x509   :  { %2372 = vmatpush.msra.mxu2 %v699_v10  ;;  %v2084_v1 = vadd.f32 %v2083_v5, %v2031_v57 }
 0x50a   :  { %2326 = vmatpush.msrb.mxu0 %v664_v52  ;;  %2349 = vmatpush.msra.mxu1 %v680_v9  ;;  %v693_v52 = vld [vmem:[#allocation7 + $0x250] sm:$0xff]  ;;  %v692_v9 = vld [vmem:[#allocation7 + $0x248] sm:$0xff] }
 0x50b   :  { %2373 = vmatpush.msra.mxu2 %v698_v22 }
 0x50c   :  { %2327 = vmatpush.msrb.mxu0 %v663_v51  ;;  %2350 = vmatpush.msra.mxu1 %v679_v56  ;;  %v2591_v51 = vld [vmem:[#allocation7 + $0x2c3] ss:$0 sm:$0xff] }
 0x50d   :  { %2374 = vmatpush.msra.mxu2 %v697_v47 }
 0x50e   :  { %2328 = vmatpush.msrb.mxu0 %v662_v34  ;;  %2351 = vmatpush.msra.mxu1 %v678_v32 }
 0x50f   :  { %2375 = vmatpush.msra.mxu2 %v696_v25 }
 0x510   :  { %2329 = vmatpush.msrb.mxu0 %v661_v35  ;;  %2352 = vmatpush.msra.mxu1 %v677_v6 }
 0x511   :  { %2376 = vmatpush.msra.mxu2 %v695_v41 }
 0x512   :  { %2330 = vmatpush.msrb.mxu0 %v660_v46  ;;  %2353 = vmatpush.msra.mxu1 %v676_v7 }
 0x513   :  { %2377 = vmatpush.msra.mxu2 %v694_v43 }
 0x514   :  { %2331 = vmatpush.msrb.mxu0 %v659_v44  ;;  %2354 = vmatpush.msra.mxu1 %v675_v54 }
 0x515   :  { %2378 = vmatpush.msra.mxu2 %v693_v52 }
 0x517   :  { %2379 = vmatpush.msra.mxu2 %v692_v9 }
 0x519   :  { %2380 = vmatpush.msra.mxu2 %v691_v45 }
 0x543   :  { %v2267_v40 = vpop.f32.mrf.mxu2  ;;  %v2290_v13 = vpop.f32.mrf.mxu3 }
 0x574   :  { %v2167_v33 = vpop.f32.mrf.mxu0  ;;  %v2190_v3 = vpop.f32.mrf.mxu1 }
 0x575   :  { %v2196_v11 = vadd.f32 %v2167_v33, %v2058_v48  ;;  %v2197_v16 = vadd.f32 %v2190_v3, %v2081_v49 }
 0x577   :  { %v2296_v17 = vadd.f32 %v2267_v40, %v2196_v11  ;;  %v2297_v0 = vadd.f32 %v2290_v13, %v2197_v16  ;;  %v2270_v50 = vpop.f32.mrf.mxu2  ;;  %v2293_v42 = vpop.f32.mrf.mxu3 }
 0x579   :  { %v2307_v55 = vadd.f32 %v2303_v14, %v2296_v17  ;;  %v2308_v30 = vadd.f32 %v2304_v36, %v2297_v0 }
 0x57b   :  { %v2311_v27 = vmax.f32 %v2307_v55, 0.0  ;;  %v2312_v58 = vmax.f32 %v2308_v30, 0.0 }
 0x57c   :  { %v2170_v20 = vpop.f32.mrf.mxu0  ;;  %v2193_v61 = vpop.f32.mrf.mxu1 }
 0x57d   :  { %v2198_v28 = vadd.f32 %v2170_v20, %v2061_v63  ;;  %v2199_v29 = vadd.f32 %v2193_v61, %v2084_v1  ;;  %2332 = vmatmul.f32.vlgmr.msrb.gmra.mxu0 %v2311_v27  ;;  %2355 = vmatmul.f32.vlgmr.msra.gmra.mxu1 %v2312_v58 }
 0x57f   :  { %v2298_v18 = vadd.f32 %v2270_v50, %v2198_v28  ;;  %v2299_v19 = vadd.f32 %v2293_v42, %v2199_v29 }
 0x581   :  { %v2309_v24 = vadd.f32 %v2303_v14, %v2298_v18  ;;  %v2310_v31 = vadd.f32 %v2304_v36, %v2299_v19 }
 0x583   :  { %v2313_v12 = vmax.f32 %v2309_v24, 0.0  ;;  %v2314_v38 = vmax.f32 %v2310_v31, 0.0 }
 0x585   :  { %2335 = vmatmul.f32.gmra.mxu0 %v2313_v12  ;;  %2358 = vmatmul.f32.gmra.mxu1 %v2314_v38 }
 0x5fa   :  { %v2333_v56 = vpop.f32.mrf.mxu0  ;;  %v2356_v34 = vpop.f32.mrf.mxu1 }
 0x5fb   :  { %v2334_v26 = vadd.f32 %v2591_v51, %v2333_v56 }
 0x5fd   :  { %v2357_v32 = vadd.f32 %v2356_v34, %v2334_v26 }
 0x5ff   :  { %v2362_v35 = vmax.f32 %v2357_v32, 0.0 }
 0x601   :  { %2381 = vmatmul.f32.vlgmr.msra.gmra.mxu2 %v2362_v35 }
 0x602   :  { %v2336_v6 = vpop.f32.mrf.mxu0  ;;  %v2359_v7 = vpop.f32.mrf.mxu1 }
 0x603   :  { %v2337_v46 = vadd.f32 %v2591_v51, %v2336_v6 }
 0x605   :  { %v2360_v44 = vadd.f32 %v2359_v7, %v2337_v46 }
 0x607   :  { %v2363_v54 = vmax.f32 %v2360_v44, 0.0 }
 0x609   :  { %2384 = vmatmul.f32.gmra.mxu2 %v2363_v54 }
 0x684   :  { %v2382_v37 = vpop.f32.mrf.mxu2 }
 0x685   :  { %v2383_v60 = vadd.f32 %v2592_v15, %v2382_v37 }
 0x687   :  { %2388 = vst [vmem:[#allocation10] sm:$0xff] %v2383_v60 }
 0x68c   :  { %v2385_v59 = vpop.f32.mrf.mxu2 }
 0x68d   :  { %v2386_v8 = vadd.f32 %v2592_v15, %v2385_v59 }
 0x68f   :  { %2389 = vst [vmem:[#allocation10 + $0x8] sm:$0xff] %v2386_v8 }
 0x690   :  { %2402 = dma.vmem_to_hbm [thread:$0]  %s2395_s10, 256, %s2397_s13, [#allocation4], %s2800_s23, %s2800_s23, %s2801_s24  }
 0x691   :  { %2797 = dma.done.wait [#allocation4], 256  }
 0x692   :  { %2798 = vsyncadd [#allocation4], 4294967040 }
 0x693   :  { %2407 = vsyncpa [#allocation3], 1 }
 0x694   :  { %2408 = vsyncpa [#allocation6], 1 }
 0x695   :  { %2409 = vsyncpa [#allocation9], 1 }
 0x696   :  { %2410 = vsyncpa [#allocation4], 1 }

</bundles_post_ra>
